<compile_context>
chip_gen: v6e
topology: v6e:2x2x1
jax: 0.10.0
libtpu: 0.0.40
codegen_flags: <defaults>
</compile_context>

<pallas_src>
import functools

import jax
import jax.numpy as jnp
from jax.experimental import pallas as pl
from jax.experimental.pallas import tpu as pltpu


def _round_up(x, m):
    return ((x + m - 1) // m) * m


def _wrapper_kernel(x_ref, wb_ref, bb_ref, w1_ref, b1_ref, w2_ref, b2_ref,
                    o_ref, h_acc, *, tile_n):
    k = pl.program_id(0)

    @pl.when(k == 0)
    def _():
        h_acc[...] = jnp.zeros_like(h_acc)

    # Backbone stand-in, one tile_n-wide column tile of Wb:
    #   feat_k = x @ Wb[:, k*T:(k+1)*T] + bb[k*T:(k+1)*T]         (B_p, T) f32
    off = pl.multiple_of(k * tile_n, tile_n)
    bb_tile = bb_ref[:, pl.ds(off, tile_n)]          # resident bias, sliced
    feat = jnp.dot(x_ref[...], wb_ref[...],
                   preferred_element_type=jnp.float32) + bb_tile

    # fc[0] ReLU, then this tile's partial contribution to fc[1] Linear(1000,128):
    #   h += relu(feat_k) @ W1[k*T:(k+1)*T, :]
    h_acc[...] += jnp.dot(jnp.maximum(feat, 0.0).astype(w1_ref.dtype),
                          w1_ref[...], preferred_element_type=jnp.float32)

    @pl.when(k == pl.num_programs(0) - 1)
    def _():
        # fc[1] bias, fc[2] ReLU, fc[3] Linear(128, num_class) (lane-padded).
        h = jnp.maximum(h_acc[...] + b1_ref[...], 0.0)
        out = jnp.dot(h.astype(w2_ref.dtype), w2_ref[...],
                      preferred_element_type=jnp.float32) + b2_ref[...]
        o_ref[...] = out.astype(o_ref.dtype)


def prepare_network_wrapper_params(wb, bb, w1, b1, w2, b2, *, tile_n=512):
    """One-time (init-time) padding + bf16 cast of the weights.

    Weights are stored (in_features, out_features): numerically identical to
    PyTorch's x @ W.T + b with W_torch = W.T.  Zero-padding is exact:
    padded feat columns are 0, ReLU(0)=0, zero W1 rows / W2 cols / bias
    entries contribute nothing.
    """
    k_in = wb.shape[0]
    back = wb.shape[1]                     # 1000 backbone features
    hid = w1.shape[1]                      # 128 hidden units
    nc = w2.shape[1]                       # num_class

    back_p = _round_up(back, tile_n)       # 1024: lane/MXU-aligned feature dim
    hid_p = _round_up(hid, 128)            # lane-aligned hidden dim
    nc_p = _round_up(max(nc, 128), 128)    # >=128: lane-dense output stores

    wb_p = jnp.zeros((k_in, back_p), jnp.bfloat16).at[:, :back].set(
        wb.astype(jnp.bfloat16))
    bb_p = jnp.zeros((1, back_p), jnp.float32).at[:, :back].set(
        bb.reshape(1, -1))
    w1_p = jnp.zeros((back_p, hid_p), jnp.bfloat16).at[:back, :hid].set(
        w1.astype(jnp.bfloat16))
    b1_p = jnp.zeros((1, hid_p), jnp.float32).at[:, :hid].set(
        b1.reshape(1, -1))
    w2_p = jnp.zeros((hid_p, nc_p), jnp.bfloat16).at[:hid, :nc].set(
        w2.astype(jnp.bfloat16))
    b2_p = jnp.zeros((1, nc_p), jnp.float32).at[:, :nc].set(
        b2.reshape(1, -1))

    return wb_p, bb_p, w1_p, b1_p, w2_p, b2_p


def network_wrapper_forward(x, wb_p, bb_p, w1_p, b1_p, w2_p, b2_p,
                            *, num_class, tile_n=512):
    """x: (B, C, H, W) f32; *_p: pre-padded bf16/f32 params from
    prepare_network_wrapper_params.  Returns logits (B, num_class) f32."""
    B = x.shape[0]
    x_flat = x.reshape(B, -1).astype(jnp.bfloat16)   # row-major like torch.flatten
    k_in = x_flat.shape[1]

    back_p = wb_p.shape[1]
    hid_p = w1_p.shape[1]
    nc_p = w2_p.shape[1]
    assert back_p % tile_n == 0, (back_p, tile_n)
    assert k_in == wb_p.shape[0], (k_in, wb_p.shape)

    # Pad batch to a sublane multiple (8) -> unmasked full-vreg stores; padded
    # rows are garbage-but-ignored and sliced off below.
    B_p = _round_up(B, 8)
    if B_p != B:
        x_flat = jnp.zeros((B_p, k_in), jnp.bfloat16).at[:B, :].set(x_flat)

    grid = (back_p // tile_n,)   # 2 streamed (double-buffered) Wb column tiles

    out_pad = pl.pallas_call(
        functools.partial(_wrapper_kernel, tile_n=tile_n),
        out_shape=jax.ShapeDtypeStruct((B_p, nc_p), jnp.float32),
        grid=grid,
        in_specs=[
            pl.BlockSpec((B_p, k_in), lambda k: (0, 0)),       # x: resident
            pl.BlockSpec((k_in, tile_n), lambda k: (0, k)),    # Wb: stream col tiles
            pl.BlockSpec((1, back_p), lambda k: (0, 0)),       # bb: resident, sliced
            pl.BlockSpec((tile_n, hid_p), lambda k: (k, 0)),   # W1: matching row tiles
            pl.BlockSpec((1, hid_p), lambda k: (0, 0)),        # b1: resident
            pl.BlockSpec((hid_p, nc_p), lambda k: (0, 0)),     # W2: resident
            pl.BlockSpec((1, nc_p), lambda k: (0, 0)),         # b2: resident
        ],
        out_specs=pl.BlockSpec((B_p, nc_p), lambda k: (0, 0)),  # written last step
        scratch_shapes=[pltpu.VMEM((B_p, hid_p), jnp.float32)],  # hidden accumulator
        compiler_params=pltpu.CompilerParams(
            dimension_semantics=("arbitrary",),   # reduction axis (accumulator)
            vmem_limit_bytes=32 << 20,
        ),
    )(x_flat, wb_p, bb_p, w1_p, b1_p, w2_p, b2_p)

    return out_pad[:B, :num_class]


def _init_linear(key, fan_in, fan_out):
    # Mimic PyTorch nn.Linear default init: U(-1/sqrt(fan_in), 1/sqrt(fan_in)).
    kw, kb = jax.random.split(key)
    bound = 1.0 / jnp.sqrt(jnp.float32(fan_in))
    w = jax.random.uniform(kw, (fan_in, fan_out), jnp.float32, -bound, bound)
    b = jax.random.uniform(kb, (1, fan_out), jnp.float32, -bound, bound)
    return w, b


if __name__ == "__main__":
    key = jax.random.PRNGKey(0)
    k_x, k_bb, k_1, k_2 = jax.random.split(key, 4)

    # Small, forward-consistent shapes.
    B, C, H, W = 2, 4, 16, 16            # input NCHW
    in_features = C * H * W              # 1024 after flatten
    backbone_out = 1000                  # `model` output width (fixed by fc)
    hidden_units = 128
    num_class = 10

    x = jax.random.normal(k_x, (B, C, H, W), jnp.float32)

    wb, bb = _init_linear(k_bb, in_features, backbone_out)   # backbone stand-in
    w1, b1 = _init_linear(k_1, backbone_out, hidden_units)   # fc[1]: Linear(1000,128)
    w2, b2 = _init_linear(k_2, hidden_units, num_class)      # fc[3]: Linear(128,nc)

    # One-time weight pad/cast (hoisted out of the per-call forward path).
    params = jax.block_until_ready(
        prepare_network_wrapper_params(wb, bb, w1, b1, w2, b2))

    fwd = jax.jit(functools.partial(network_wrapper_forward,
                                    num_class=num_class))
    out = fwd(x, *params)
    out = jax.block_until_ready(out)

    # Pure-JAX reference of the same bf16-weight / f32-accumulate math.
    xf = x.reshape(B, -1).astype(jnp.bfloat16)
    feat = jnp.dot(xf, wb.astype(jnp.bfloat16),
                   preferred_element_type=jnp.float32) + bb
    h = jnp.maximum(
        jnp.dot(jnp.maximum(feat, 0.0).astype(jnp.bfloat16),
                w1.astype(jnp.bfloat16),
                preferred_element_type=jnp.float32) + b1, 0.0)
    ref = jnp.dot(h.astype(jnp.bfloat16), w2.astype(jnp.bfloat16),
                  preferred_element_type=jnp.float32) + b2

    assert out.shape == (B, num_class)
    assert jnp.allclose(out, ref, atol=5e-3, rtol=5e-3), float(
        jnp.max(jnp.abs(out - ref)))
    print("KERNEL_OK")
</pallas_src>

<mosaic_0001>
module attributes {stable_mosaic.version = 11 : i64} {
  func.func @_wrapper_kernel(%arg0: i32, %arg1: memref<8x1024xbf16, #tpu.memory_space<vmem>>, %arg2: memref<1024x512xbf16, #tpu.memory_space<vmem>>, %arg3: memref<1x1024xf32, #tpu.memory_space<vmem>>, %arg4: memref<512x128xbf16, #tpu.memory_space<vmem>>, %arg5: memref<1x128xf32, #tpu.memory_space<vmem>>, %arg6: memref<128x128xbf16, #tpu.memory_space<vmem>>, %arg7: memref<1x128xf32, #tpu.memory_space<vmem>>, %arg8: memref<8x128xf32, #tpu.memory_space<vmem>>, %arg9: memref<8x128xf32, #tpu.memory_space<vmem>>) attributes {dimension_semantics = [#tpu.dimension_semantics<arbitrary>], iteration_bounds = array<i64: 2>, scalar_prefetch = 0 : i64, scratch_operands = 1 : i64, tpu.core_type = #tpu.core_type<tc>, window_params = [{pipeline_mode = #tpu.pipeline_mode<synchronous>, transform_indices = @transform_0, window_bounds = array<i64: 8, 1024>}, {transform_indices = @transform_1, window_bounds = array<i64: 1024, 512>}, {pipeline_mode = #tpu.pipeline_mode<synchronous>, transform_indices = @transform_2, window_bounds = array<i64: 1, 1024>}, {transform_indices = @transform_3, window_bounds = array<i64: 512, 128>}, {pipeline_mode = #tpu.pipeline_mode<synchronous>, transform_indices = @transform_4, window_bounds = array<i64: 1, 128>}, {pipeline_mode = #tpu.pipeline_mode<synchronous>, transform_indices = @transform_5, window_bounds = array<i64: 128, 128>}, {pipeline_mode = #tpu.pipeline_mode<synchronous>, transform_indices = @transform_6, window_bounds = array<i64: 1, 128>}, {pipeline_mode = #tpu.pipeline_mode<synchronous>, transform_indices = @transform_7, window_bounds = array<i64: 8, 128>}]} {
    %c0_i32 = arith.constant 0 : i32
    %0 = arith.cmpi eq, %arg0, %c0_i32 : i32
    %1 = arith.extui %0 : i1 to i32
    %c0_i32_0 = arith.constant 0 : i32
    %2 = arith.cmpi ne, %1, %c0_i32_0 : i32
    scf.if %2 {
      %cst_14 = arith.constant 0.000000e+00 : f32
      %23 = vector.broadcast %cst_14 : f32 to vector<8x128xf32>
      %c0_15 = arith.constant 0 : index
      %c0_16 = arith.constant 0 : index
      %24 = vector.load %arg9[%c0_15, %c0_16] : memref<8x128xf32, #tpu.memory_space<vmem>>, vector<8x128xf32>
      tpu.vector_store %arg9[%c0_15, %c0_16], %23 {strides = array<i32>} : memref<8x128xf32, #tpu.memory_space<vmem>>, vector<8x128xf32>,
    } else {
    }
    %c512_i32 = arith.constant 512 : i32
    %3 = arith.muli %arg0, %c512_i32 : i32
    %4 = tpu.assume_multiple %3, 512 : i32
    %c0 = arith.constant 0 : index
    %5 = arith.index_cast %4 : i32 to index
    %6 = vector.load %arg3[%c0, %5] : memref<1x1024xf32, #tpu.memory_space<vmem>>, vector<1x512xf32>
    %c0_1 = arith.constant 0 : index
    %c0_2 = arith.constant 0 : index
    %7 = vector.load %arg1[%c0_1, %c0_2] : memref<8x1024xbf16, #tpu.memory_space<vmem>>, vector<8x1024xbf16>
    %c0_3 = arith.constant 0 : index
    %c0_4 = arith.constant 0 : index
    %8 = vector.load %arg2[%c0_3, %c0_4] : memref<1024x512xbf16, #tpu.memory_space<vmem>>, vector<1024x512xbf16>
    %cst = arith.constant dense<0.000000e+00> : vector<8x512xf32>
    %9 = tpu.matmul %7, %8, %cst {dimension_numbers = #tpu.dot_dimension_numbers<[1], [0], [0], [1], [0, 0, 1, 1], [], []>} : vector<8x1024xbf16>, vector<1024x512xbf16>, vector<8x512xf32> -> vector<8x512xf32>
    %10 = vector.broadcast %6 : vector<1x512xf32> to vector<8x512xf32>
    %11 = arith.addf %9, %10 : vector<8x512xf32>
    %c0_5 = arith.constant 0 : index
    %c0_6 = arith.constant 0 : index
    %12 = vector.load %arg9[%c0_5, %c0_6] : memref<8x128xf32, #tpu.memory_space<vmem>>, vector<8x128xf32>
    %cst_7 = arith.constant 0.000000e+00 : f32
    %13 = vector.broadcast %cst_7 : f32 to vector<8x512xf32>
    %14 = arith.maximumf %11, %13 : vector<8x512xf32>
    %15 = arith.truncf %14 : vector<8x512xf32> to vector<8x512xbf16>
    %c0_8 = arith.constant 0 : index
    %c0_9 = arith.constant 0 : index
    %16 = vector.load %arg4[%c0_8, %c0_9] : memref<512x128xbf16, #tpu.memory_space<vmem>>, vector<512x128xbf16>
    %cst_10 = arith.constant dense<0.000000e+00> : vector<8x128xf32>
    %17 = tpu.matmul %15, %16, %cst_10 {dimension_numbers = #tpu.dot_dimension_numbers<[1], [0], [0], [1], [0, 0, 1, 1], [], []>} : vector<8x512xbf16>, vector<512x128xbf16>, vector<8x128xf32> -> vector<8x128xf32>
    %18 = arith.addf %12, %17 : vector<8x128xf32>
    %c0_11 = arith.constant 0 : index
    %c0_12 = arith.constant 0 : index
    %19 = vector.load %arg9[%c0_11, %c0_12] : memref<8x128xf32, #tpu.memory_space<vmem>>, vector<8x128xf32>
    tpu.vector_store %arg9[%c0_11, %c0_12], %18 {strides = array<i32>} : memref<8x128xf32, #tpu.memory_space<vmem>>, vector<8x128xf32>,
    %c1_i32 = arith.constant 1 : i32
    %20 = arith.cmpi eq, %arg0, %c1_i32 : i32
    %21 = arith.extui %20 : i1 to i32
    %c0_i32_13 = arith.constant 0 : i32
    %22 = arith.cmpi ne, %21, %c0_i32_13 : i32
    scf.if %22 {
      %c0_14 = arith.constant 0 : index
      %c0_15 = arith.constant 0 : index
      %23 = vector.load %arg9[%c0_14, %c0_15] : memref<8x128xf32, #tpu.memory_space<vmem>>, vector<8x128xf32>
      %c0_16 = arith.constant 0 : index
      %c0_17 = arith.constant 0 : index
      %24 = vector.load %arg5[%c0_16, %c0_17] : memref<1x128xf32, #tpu.memory_space<vmem>>, vector<1x128xf32>
      %25 = vector.broadcast %24 : vector<1x128xf32> to vector<8x128xf32>
      %26 = arith.addf %23, %25 : vector<8x128xf32>
      %cst_18 = arith.constant 0.000000e+00 : f32
      %27 = vector.broadcast %cst_18 : f32 to vector<8x128xf32>
      %28 = arith.maximumf %26, %27 : vector<8x128xf32>
      %29 = arith.truncf %28 : vector<8x128xf32> to vector<8x128xbf16>
      %c0_19 = arith.constant 0 : index
      %c0_20 = arith.constant 0 : index
      %30 = vector.load %arg6[%c0_19, %c0_20] : memref<128x128xbf16, #tpu.memory_space<vmem>>, vector<128x128xbf16>
      %cst_21 = arith.constant dense<0.000000e+00> : vector<8x128xf32>
      %31 = tpu.matmul %29, %30, %cst_21 {dimension_numbers = #tpu.dot_dimension_numbers<[1], [0], [0], [1], [0, 0, 1, 1], [], []>} : vector<8x128xbf16>, vector<128x128xbf16>, vector<8x128xf32> -> vector<8x128xf32>
      %c0_22 = arith.constant 0 : index
      %c0_23 = arith.constant 0 : index
      %32 = vector.load %arg7[%c0_22, %c0_23] : memref<1x128xf32, #tpu.memory_space<vmem>>, vector<1x128xf32>
      %33 = vector.broadcast %32 : vector<1x128xf32> to vector<8x128xf32>
      %34 = arith.addf %31, %33 : vector<8x128xf32>
      %c0_24 = arith.constant 0 : index
      %c0_25 = arith.constant 0 : index
      %35 = vector.load %arg8[%c0_24, %c0_25] : memref<8x128xf32, #tpu.memory_space<vmem>>, vector<8x128xf32>
      tpu.vector_store %arg8[%c0_24, %c0_25], %34 {strides = array<i32>} : memref<8x128xf32, #tpu.memory_space<vmem>>, vector<8x128xf32>,
    } else {
    }
    return
  }
  func.func @transform_0(%arg0: i32) -> (i32, i32) {
    %c0_i32 = arith.constant 0 : i32
    %c0_i32_0 = arith.constant 0 : i32
    %c0_i32_1 = arith.constant 0 : i32
    return %c0_i32, %c0_i32_0 : i32, i32
  }
  func.func @transform_1(%arg0: i32) -> (i32, i32) {
    %c0_i32 = arith.constant 0 : i32
    %c0_i32_0 = arith.constant 0 : i32
    return %c0_i32, %arg0 : i32, i32
  }
  func.func @transform_2(%arg0: i32) -> (i32, i32) {
    %c0_i32 = arith.constant 0 : i32
    %c0_i32_0 = arith.constant 0 : i32
    %c0_i32_1 = arith.constant 0 : i32
    return %c0_i32, %c0_i32_0 : i32, i32
  }
  func.func @transform_3(%arg0: i32) -> (i32, i32) {
    %c0_i32 = arith.constant 0 : i32
    %c0_i32_0 = arith.constant 0 : i32
    return %arg0, %c0_i32 : i32, i32
  }
  func.func @transform_4(%arg0: i32) -> (i32, i32) {
    %c0_i32 = arith.constant 0 : i32
    %c0_i32_0 = arith.constant 0 : i32
    %c0_i32_1 = arith.constant 0 : i32
    return %c0_i32, %c0_i32_0 : i32, i32
  }
  func.func @transform_5(%arg0: i32) -> (i32, i32) {
    %c0_i32 = arith.constant 0 : i32
    %c0_i32_0 = arith.constant 0 : i32
    %c0_i32_1 = arith.constant 0 : i32
    return %c0_i32, %c0_i32_0 : i32, i32
  }
  func.func @transform_6(%arg0: i32) -> (i32, i32) {
    %c0_i32 = arith.constant 0 : i32
    %c0_i32_0 = arith.constant 0 : i32
    %c0_i32_1 = arith.constant 0 : i32
    return %c0_i32, %c0_i32_0 : i32, i32
  }
  func.func @transform_7(%arg0: i32) -> (i32, i32) {
    %c0_i32 = arith.constant 0 : i32
    %c0_i32_0 = arith.constant 0 : i32
    %c0_i32_1 = arith.constant 0 : i32
    return %c0_i32, %c0_i32_0 : i32, i32
  }
}

</mosaic_0001>

<bundles_post_ra>
// kernel: network_wrapper_forward.1
= control target key start
LH: loop header
LB: loop body
LE: loop exit
PB: predicated region body
PF: predicated region fallthrough
CT: control target
= control target key end

     0   :  { %12 = vsyncpa [#allocation4], 0  ;;  %s4643_s0 = inlined_call_operand.vmem [shape: bf16[8,1024], index: 0, kind: input, shape index: {}]   ;;  %s4644_s1 = inlined_call_operand.hbm [shape: bf16[1024,1024], index: 1, kind: input, shape index: {}]   ;;  %s4645_s2 = inlined_call_operand.hbm [shape: f32[1,1024], index: 2, kind: input, shape index: {}]   ;;  %s4646_s3 = inlined_call_operand.hbm [shape: bf16[1024,128], index: 3, kind: input, shape index: {}]   ;;  %s4647_s4 = inlined_call_operand.hbm [shape: f32[1,128], index: 4, kind: input, shape index: {}]   ;;  %s4648_s5 = inlined_call_operand.hbm [shape: bf16[128,128], index: 5, kind: input, shape index: {}]   ;;  %s4649_s6 = inlined_call_operand.hbm [shape: f32[1,128], index: 6, kind: input, shape index: {}]   ;;  %s4650_s7 = inlined_call_operand.vmem [shape: f32[8,128], index: 7, kind: output, shape index: {}]  }
   0x1   :  { %14 = vsyncpa [#allocation4 + $0x1], 0 }
   0x2   :  { %15 = vsyncpa [#allocation6], 0 }
   0x3   :  { %16 = vsyncpa [#allocation10], 0  ;;  %s4072_s24 = smov 0   ;;  %s4074_s25 = smov 0  }
   0x4   :  { %s4076_s26 = smov 0   ;;  %s4078_s27 = smov 0  }
   0x5 LB: > { %s4091_s28 = sadd.s32 4294967295, %s4016_s27   ;;  %p63_p0 = scmp.ne.s32.totalorder %s4008_s25, %s4004_s24  ;;  %s4016_s27 = sphi %s4078_s27, %s4682_s27   ;;  %s4012_s26 = sphi %s4076_s26, %s4681_s26   ;;  %s4008_s25 = sphi %s4074_s25, %s4680_s25   ;;  %s4004_s24 = sphi %s4072_s24, %s4679_s24  }
   0x6   : > { %p4651_p1 = scmp.eq.s32.totalorder %s4091_s28, 0  ;;  %p2876_p2 = scmp.ge.s32.totalorder %s4016_s27, 1 }
   0x7   : > { %p205_p3 = scmp.lt.s32.totalorder %s4016_s27, 3  ;;  %s4018_s8 = smov [#allocation5]  }
   0x8   : > { %p4100_p5 = por %p4651_p1, %p63_p0  ;;  %s221_s9 = sshll.u32 %s4018_s8, 4  ;;  %s222_s9 = int_to_ptr.vmem [resolvable:$true] %s221_s9 }
   0x9   : > { %p4104_p6 = pnand %p2876_p2, %p205_p3  ;;  %s4019_s10 = smov [#allocation9]  }
   0xa   : > { %s4659_s29 = scalar_select %p4100_p5, 1, 0 }
   0xb   : > { %s4660_s30 = scalar_select %p4104_p6, 1, 0 }
   0xc   : > { %p3301_p7 = pneg %p4104_p6  ;;  %s242_s11 = sshll.u32 %s4019_s10, 4  ;;  %s243_s11 = int_to_ptr.vmem [resolvable:$true] %s242_s11 }
   0xd   : > { %s3817_s13 = scalar_lea.vmem %s222_s9, 128  ;;  %p3825_p13 = scmp.lt.s32.totalorder %s222_s9, %s222_s9 }
   0xe   : > { %p4112_p8 = pnand %p3301_p7, %p4651_p1  ;;  %p3818_p10 = scmp.ne.s32.totalorder %s222_s9, %s3817_s13 }
   0xf   : > { %p3826_p0 = scmp.lt.s32.totalorder %s3817_s13, %s3817_s13 }
  0x10   : > { %p4656_p9 = pneg %p4112_p8 }
  0x11   : > { %p3827_p2 = por %p3826_p0, %p3825_p13 }
  0x12   : > { %p3820_p11 = pnand %p3818_p10, %p4656_p9 }
  0x14   : > { %p3821_p12 = pneg %p3820_p11 }
  0x16   : > { %p3828_p3 = pnand %p3827_p2, %p3821_p12 }
  0x18   : > { %3831 = shalt.err (!%p3828_p3)
}
  0x19   : > { %3304 = dma.hbm_to_vmem [thread:$0]  (!%p4112_p8), %s4645_s2, 128, %s222_s9, [#allocation6]  }
  0x1a   : > { %s3843_s16 = scalar_lea.vmem %s243_s11, 1024  ;;  %p3851_p10 = scmp.lt.s32.totalorder %s243_s11, %s243_s11 }
  0x1b   : > { %p3844_p7 = scmp.ne.s32.totalorder %s243_s11, %s3843_s16  ;;  %p3852_p11 = scmp.lt.s32.totalorder %s3843_s16, %s3843_s16 }
  0x1d   : > { %p3846_p4 = pnand %p3844_p7, %p4656_p9  ;;  %p3853_p5 = por %p3852_p11, %p3851_p10 }
  0x1f   : > { %p3847_p1 = pneg %p3846_p4 }
  0x21   : > { %p3854_p6 = pnand %p3853_p5, %p3847_p1 }
  0x23   : > { %3857 = shalt.err (!%p3854_p6)
}
  0x24   : > { %s4654_s17 = smov 64   ;;  %s4655_s18 = smov 4  }
  0x25   : > { %3310 = dma.hbm_to_vmem [thread:$0]  (!%p4112_p8), %s4648_s5, 1024, %s243_s11, [#allocation10], %s4654_s17, %s4654_s17, %s4655_s18  }
  0x26   : > { %s4138_s21 = sadd.s32 1, %s4016_s27   ;;  %s50_s22 = sadd.s32 1, %s4012_s26 }
  0x27   : > { %s47_s23 = ssub.s32 %s4016_s27, %s4138_s21  ;;  %p57_p1 = scmp.ne.s32.totalorder %s4012_s26, %s4008_s25 }
  0x28   : > { %p48_p4 = scmp.eq.s32.totalorder %s47_s23, 0  ;;  %p58_p5 = scmp.eq.s32.totalorder %s4016_s27, 0 }
  0x29   : > { %p3325_p6 = scmp.lt.s32.totalorder %s4016_s27, 2  ;;  %s267_s24 = sand.u32 1, %s4016_s27  }
  0x2a   : > { %s4149_s8 = scalar_select %p48_p4, %s4012_s26, %s50_s22  }
  0x2b   : > { %p59_p12 = por %p58_p5, %p57_p1  ;;  %s4657_s9 = sand.u32 1, %s4012_s26  }
  0x2c   : > { %s3206_s10 = sshll.u32 %s4016_s27, 8  ;;  %s2882_s13 = sshll.u32 %s4657_s9, 11 }
  0x2d   : > { %s4158_s11 = scalar_lea.hbm %s4644_s1, %s3206_s10  ;;  %p4160_p13 = pnand %p3325_p6, %p59_p12 }
  0x2e   : > { %s271_s19 = scalar_lea.vmem [#allocation3], %s2882_s13  ;;  %s4166_s22 = scalar_lea.sflag [#allocation4], %s267_s24 }
  0x2f   : > { %s278_s20 = sshll.u32 %s271_s19, 4  ;;  %s3858_s23 = scalar_lea.hbm %s4158_s11, 32768  ;;  %s4164_s20 = int_to_ptr.vmem [resolvable:$true] %s278_s20 }
  0x30   : > { %p3859_p0 = scmp.ne.s32.totalorder %s4158_s11, %s3858_s23  ;;  %p4658_p2 = pneg %p4160_p13 }
  0x31   : > { %s3863_s15 = scalar_lea.hbm %s4644_s1, 65536  ;;  %p3864_p10 = scmp.lt.s32.totalorder %s4158_s11, %s4644_s1 }
  0x32   : > { %p3861_p3 = pnand %p4658_p2, %p3859_p0  ;;  %p3865_p11 = scmp.lt.s32.totalorder %s3863_s15, %s3858_s23 }
  0x34   : > { %p3862_p7 = pneg %p3861_p3  ;;  %p3866_p1 = por %p3865_p11, %p3864_p10 }
  0x36   : > { %p3867_p4 = pnand %p3866_p1, %p3862_p7 }
  0x38   : > { %3870 = shalt.err (!%p3867_p4)
}
  0x39   : > { %s3871_s24 = scalar_lea.vmem %s4164_s20, 32768  ;;  %s4022_s13 = smov [#allocation3]  }
  0x3a   : > { %p3872_p5 = scmp.ne.s32.totalorder %s4164_s20, %s3871_s24  ;;  %s3876_s19 = sshll.u32 %s4022_s13, 4  ;;  %s3877_s19 = int_to_ptr.vmem [resolvable:$false] %s3876_s19 }
  0x3b   : > { %s3878_s10 = scalar_lea.vmem %s3877_s19, 65536  ;;  %p3879_p0 = scmp.lt.s32.totalorder %s4164_s20, %s3877_s19 }
  0x3c   : > { %p3874_p6 = pnand %p3872_p5, %p4658_p2  ;;  %p3880_p3 = scmp.lt.s32.totalorder %s3878_s10, %s3871_s24 }
  0x3e   : > { %p3875_p12 = pneg %p3874_p6  ;;  %p3881_p9 = por %p3880_p3, %p3879_p0 }
  0x40   : > { %p3882_p10 = pnand %p3881_p9, %p3875_p12 }
  0x42   : > { %3885 = shalt.err (!%p3882_p10)
}
  0x43   : > { %s4023_s17 = smov 512   ;;  %s4024_s18 = smov 256  }
  0x44   : > { %s4025_s23 = smov 16   ;;  %s4026_s14 = smov [#allocation8]  }
  0x45   : > { %3317 = dma.hbm_to_vmem [thread:$0]  (!%p4160_p13), %s4158_s11, 32768, %s4164_s20, %s4166_s22, %s4023_s17, %s4024_s18, %s4025_s23  }
  0x46   : > { %s232_s15 = sshll.u32 %s4026_s14, 4  ;;  %s4027_s13 = smov [#allocation11]   ;;  %s233_s15 = int_to_ptr.vmem [resolvable:$true] %s232_s15 }
  0x47   : > { %s256_s9 = sshll.u32 %s4027_s13, 4  ;;  %s3897_s24 = scalar_lea.vmem %s233_s15, 16  ;;  %s257_s9 = int_to_ptr.vmem [resolvable:$true] %s256_s9 }
  0x48   : > { %p3898_p7 = scmp.ne.s32.totalorder %s233_s15, %s3897_s24  ;;  %p4663_p9 = pneg %p4112_p8 }
  0x49   : > { %s3904_s19 = scalar_lea.vmem %s233_s15, 32  ;;  %p3905_p4 = scmp.lt.s32.totalorder %s233_s15, %s233_s15 }
  0x4a   : > { %p3900_p11 = pnand %p3898_p7, %p4663_p9  ;;  %p3906_p5 = scmp.lt.s32.totalorder %s3904_s19, %s3897_s24 }
  0x4c   : > { %p3901_p1 = pneg %p3900_p11  ;;  %p3907_p6 = por %p3906_p5, %p3905_p4 }
  0x4e   : > { %p3908_p12 = pnand %p3907_p6, %p3901_p1 }
  0x50   : > { %3911 = shalt.err (!%p3908_p12)
}
  0x51   : > { %3307 = dma.hbm_to_vmem [thread:$0]  (!%p4112_p8), %s4647_s4, 16, %s233_s15, [#allocation6]  }
  0x52   : > { %s3923_s10 = scalar_lea.vmem %s257_s9, 16  ;;  %p4664_p3 = pmov %p4663_p9 }
  0x53   : > { %p3924_p0 = scmp.ne.s32.totalorder %s257_s9, %s3923_s10  ;;  %s3930_s17 = scalar_lea.vmem %s257_s9, 32 }
  0x54   : > { %p3931_p9 = scmp.lt.s32.totalorder %s257_s9, %s257_s9  ;;  %p3932_p11 = scmp.lt.s32.totalorder %s3930_s17, %s3923_s10 }
  0x55   : > { %p3926_p10 = pnand %p3924_p0, %p4664_p3 }
  0x56   : > { %p3933_p2 = por %p3932_p11, %p3931_p9 }
  0x57   : > { %p3927_p7 = pneg %p3926_p10 }
  0x59   : > { %p3934_p4 = pnand %p3933_p2, %p3927_p7 }
  0x5b   : > { %3937 = shalt.err (!%p3934_p4)
}
  0x5c   : > { %3313 = dma.hbm_to_vmem [thread:$0]  (!%p4112_p8), %s4649_s6, 16, %s257_s9, [#allocation10]  }
  0x5d   : > { %s4665_s14 = sand.u32 1, %s4012_s26   ;;  %s3207_s13 = sshll.u32 %s4016_s27, 12 }
  0x5e   : > { %s2885_s15 = sshll.u32 %s4665_s14, 8  ;;  %s4215_s11 = scalar_lea.hbm %s4646_s3, %s3207_s13 }
  0x5f   : > { %s292_s20 = scalar_lea.vmem [#allocation7], %s2885_s15  ;;  %s3938_s10 = scalar_lea.hbm %s4215_s11, 4096 }
  0x60   : > { %s299_s12 = sshll.u32 %s292_s20, 4  ;;  %p3939_p2 = scmp.ne.s32.totalorder %s4215_s11, %s3938_s10  ;;  %s300_s12 = int_to_ptr.vmem [resolvable:$true] %s299_s12 }
  0x61   : > { %p4666_p1 = pneg %p4160_p13  ;;  %s3943_s27 = scalar_lea.hbm %s4646_s3, 8192 }
  0x62   : > { %p3944_p6 = scmp.lt.s32.totalorder %s4215_s11, %s4646_s3  ;;  %p3945_p12 = scmp.lt.s32.totalorder %s3943_s27, %s3938_s10 }
  0x63   : > { %p3941_p5 = pnand %p3939_p2, %p4666_p1 }
  0x64   : > { %p3946_p0 = por %p3945_p12, %p3944_p6 }
  0x65   : > { %p3942_p8 = pneg %p3941_p5 }
  0x67   : > { %p3947_p3 = pnand %p3946_p0, %p3942_p8 }
  0x69   : > { %3950 = shalt.err (!%p3947_p3)
}
  0x6a   : > { %s3951_s14 = scalar_lea.vmem %s300_s12, 4096  ;;  %p4667_p7 = pmov %p4666_p1 }
  0x6b   : > { %p3952_p10 = scmp.ne.s32.totalorder %s300_s12, %s3951_s14  ;;  %s4028_s15 = smov [#allocation7]  }
  0x6c   : > { %s3956_s13 = sshll.u32 %s4028_s15, 4  ;;  %s3957_s13 = int_to_ptr.vmem [resolvable:$false] %s3956_s13 }
  0x6d   : > { %p3954_p9 = pnand %p3952_p10, %p4667_p7  ;;  %s3958_s24 = scalar_lea.vmem %s3957_s13, 8192 }
  0x6e   : > { %p3959_p4 = scmp.lt.s32.totalorder %s300_s12, %s3957_s13  ;;  %p3960_p2 = scmp.lt.s32.totalorder %s3958_s24, %s3951_s14 }
  0x6f   : > { %p3955_p11 = pneg %p3954_p9 }
  0x70   : > { %p3961_p1 = por %p3960_p2, %p3959_p4 }
  0x72   : > { %p3962_p5 = pnand %p3961_p1, %p3955_p11 }
  0x74   : > { %3965 = shalt.err (!%p3962_p5)
}
  0x75   : > { %s4668_s19 = smov 4   ;;  %s4669_s20 = smov 64  }
  0x76   : > { %3320 = dma.hbm_to_vmem [thread:$0]  (!%p4160_p13), %s4215_s11, 4096, %s300_s12, %s4166_s22, %s4669_s20, %s4669_s20, %s4668_s19  }
  0x77   : > { %p4670_p8 = scmp.ne.s32.totalorder %s4660_s30, 0 }
  0x78   : > { %s313_s10 = sand.u32 (!%p4670_p8), 1, %s4091_s28   ;;  %s315_s9 = sand.u32 (!%p4670_p8), 1, %s4008_s25  }
  0x79   : > { %311 = sbr.rel (%p4670_p8) target bundleno = 1043 (0x413), region = 48  ;;  %s2889_s17 = sshll.u32 (!%p4670_p8), %s315_s9, 11 }
  0x7a   : > { %s314_s27 = scalar_lea.sflag (!%p4670_p8), [#allocation4], %s313_s10  ;;  %s4243_s18 = scalar_lea.vmem (!%p4670_p8), [#allocation3], %s2889_s17 }
  0x7b   : > { %p4671_p6 = scmp.ne.s32.totalorder (!%p4670_p8), %s4659_s29, 0 }
  0x7e   : > { %3983 = dma.done.wait (%p4671_p6), %s314_s27, 32768  }
  0x7f   : > { %3985 = vsyncadd (%p4671_p6), %s314_s27, 4294934528  ;;  %p4672_p12 = scmp.eq.s32.totalorder %s4091_s28, 0 }
  0x81   : > { %3987 = dma.done.wait (%p4672_p12), [#allocation6], 128   ;;  %p4673_p13 = pmov %p4672_p12 }
  0x82   : > { %s2891_s30 = sshll.u32 %s315_s9, 8 }
  0x83   : > { %3989 = vsyncadd (%p4673_p13), [#allocation6], 4294967168  ;;  %s4253_s16 = scalar_lea.vmem [#allocation7], %s2891_s30 }
  0x84   : > { %3991 = dma.done.wait (%p4671_p6), %s314_s27, 4096  }
  0x85   : > { %3993 = vsyncadd (%p4671_p6), %s314_s27, 4294963200  ;;  %p4674_p0 = pmov %p4672_p12 }
  0x87   : > { %3995 = dma.done.wait (%p4674_p0), [#allocation6], 16   ;;  %p4675_p3 = pmov %p4674_p0 }
  0x88   : > { %p4676_p10 = pmov %p4674_p0 }
  0x89   : > { %3997 = vsyncadd (%p4675_p3), [#allocation6], 4294967280 }
  0x8a   : > { %3999 = dma.done.wait (%p4676_p10), [#allocation10], 1040   ;;  %p4677_p7 = pmov %p4674_p0 }
  0x8b   : > { %p4678_p9 = scmp.ne.s32.totalorder %s4091_s28, 0 }
  0x8c   : > { %4001 = vsyncadd (%p4677_p7), [#allocation10], 4294966256 }
  0x8d   : > { %379 = sbr.rel (%p4678_p9) target bundleno = 148 (0x94), region = 76 }
  0x92   : > { %v4029_v0 = vmov 0.0  }
  0x93   : > { %380 = vst [vmem:[#allocation2] sm:$0xff] %v4029_v0 }
  0x94 PF: > { %v3374_v1 = vld [vmem:[%s4243_s18 + $0xe4] ss:$16 sps:$4 sm:$0xff]   ;;  %v3378_v3 = vld [vmem:[%s4243_s18 + $0xe0] ss:$16 sps:$4 sm:$0xff]   ;;  %v386_v47 = vld [vmem:[%s4643_s0] sm:$0xff]  ;;  %s2896_s24 = sshll.u32 %s4091_s28, 9 }
  0x95   : > { %v3376_v2 = vld [vmem:[%s4243_s18 + $0x2e4] ss:$16 sps:$4 sm:$0xff]   ;;  %1975 = vmatprep.subr.bf16.mxu0 %v3374_v1  ;;  %v3379_v4 = vld [vmem:[%s4243_s18 + $0x2e0] ss:$16 sps:$4 sm:$0xff]   ;;  %v4318_v48 = vcombine.high %v386_v47, %v386_v47  ;;  %s382_s19 = sshra.s32 %s2896_s24, 7  ;;  %p3193_p11 = scmp.ne.s32.totalorder %s4091_s28, 1 }
  0x96   : > { %2016 = vmatprep.subr.bf16.mxu1 %v3376_v2  ;;  %v3380_v5 = vld [vmem:[%s4243_s18 + $0xc4] ss:$16 sps:$4 sm:$0xff]   ;;  %1976 = vmatpush1.bf16.msra.mxu0 %v3378_v3  ;;  %v3384_v7 = vld [vmem:[%s4243_s18 + $0xc0] ss:$16 sps:$4 sm:$0xff]   ;;  %s384_s20 = scalar_lea.vmem [#allocation5], %s382_s19 }
  0x97   : > { %2017 = vmatpush1.bf16.msra.mxu1 %v3379_v4  ;;  %v3382_v6 = vld [vmem:[%s4243_s18 + $0x2c4] ss:$16 sps:$4 sm:$0xff]   ;;  %1977 = vmatprep.subr.bf16.mxu0 %v3380_v5  ;;  %v3385_v8 = vld [vmem:[%s4243_s18 + $0x2c0] ss:$16 sps:$4 sm:$0xff]  }
  0x98   : > { %2018 = vmatprep.subr.bf16.mxu1 %v3382_v6  ;;  %v3386_v9 = vld [vmem:[%s4243_s18 + $0xa4] ss:$16 sps:$4 sm:$0xff]   ;;  %v3390_v11 = vld [vmem:[%s4243_s18 + $0xa0] ss:$16 sps:$4 sm:$0xff]   ;;  %2007 = vmatprep.mubr.bf16.mxu0 %v4318_v48 }
  0x99   : > { %v3388_v10 = vld [vmem:[%s4243_s18 + $0x2a4] ss:$16 sps:$4 sm:$0xff]   ;;  %v3391_v12 = vld [vmem:[%s4243_s18 + $0x2a0] ss:$16 sps:$4 sm:$0xff]  }
  0x9a   : > { %1978 = vmatpush1.bf16.msra.mxu0 %v3384_v7  ;;  %v3392_v13 = vld [vmem:[%s4243_s18 + $0x84] ss:$16 sps:$4 sm:$0xff]   ;;  %v3396_v15 = vld [vmem:[%s4243_s18 + $0x80] ss:$16 sps:$4 sm:$0xff]   ;;  %v4347_v7 = vcombine.low %v386_v47, %v386_v47 }
  0x9b   : > { %2019 = vmatpush1.bf16.msra.mxu1 %v3385_v8  ;;  %1979 = vmatprep.subr.bf16.mxu0 %v3386_v9  ;;  %v3394_v14 = vld [vmem:[%s4243_s18 + $0x284] ss:$16 sps:$4 sm:$0xff]   ;;  %v3397_v16 = vld [vmem:[%s4243_s18 + $0x280] ss:$16 sps:$4 sm:$0xff]  }
  0x9c   : > { %2020 = vmatprep.subr.bf16.mxu1 %v3388_v10  ;;  %v3398_v17 = vld [vmem:[%s4243_s18 + $0x64] ss:$16 sps:$4 sm:$0xff]   ;;  %v3402_v19 = vld [vmem:[%s4243_s18 + $0x60] ss:$16 sps:$4 sm:$0xff]  }
  0x9d   : > { %v3400_v18 = vld [vmem:[%s4243_s18 + $0x264] ss:$16 sps:$4 sm:$0xff]   ;;  %v3403_v20 = vld [vmem:[%s4243_s18 + $0x260] ss:$16 sps:$4 sm:$0xff]  }
  0x9e   : > { %1980 = vmatpush1.bf16.msra.mxu0 %v3390_v11  ;;  %v3404_v21 = vld [vmem:[%s4243_s18 + $0x44] ss:$16 sps:$4 sm:$0xff]   ;;  %v3408_v23 = vld [vmem:[%s4243_s18 + $0x40] ss:$16 sps:$4 sm:$0xff]  }
  0x9f   : > { %2021 = vmatpush1.bf16.msra.mxu1 %v3391_v12  ;;  %1981 = vmatprep.subr.bf16.mxu0 %v3392_v13  ;;  %v3406_v22 = vld [vmem:[%s4243_s18 + $0x244] ss:$16 sps:$4 sm:$0xff]   ;;  %v3409_v24 = vld [vmem:[%s4243_s18 + $0x240] ss:$16 sps:$4 sm:$0xff]  }
  0xa0   : > { %2022 = vmatprep.subr.bf16.mxu1 %v3394_v14  ;;  %v3410_v25 = vld [vmem:[%s4243_s18 + $0x24] ss:$16 sps:$4 sm:$0xff]   ;;  %v3414_v27 = vld [vmem:[%s4243_s18 + $0x20] ss:$16 sps:$4 sm:$0xff]  }
  0xa1   : > { %v3412_v26 = vld [vmem:[%s4243_s18 + $0x224] ss:$16 sps:$4 sm:$0xff]   ;;  %v3415_v28 = vld [vmem:[%s4243_s18 + $0x220] ss:$16 sps:$4 sm:$0xff]  }
  0xa2   : > { %1982 = vmatpush1.bf16.msra.mxu0 %v3396_v15  ;;  %v3416_v29 = vld [vmem:[%s4243_s18 + $0x4] ss:$16 sps:$4 sm:$0xff]   ;;  %v3420_v31 = vld [vmem:[%s4243_s18] ss:$16 sps:$4 sm:$0xff]  }
  0xa3   : > { %2023 = vmatpush1.bf16.msra.mxu1 %v3397_v16  ;;  %1983 = vmatprep.subr.bf16.mxu0 %v3398_v17  ;;  %v3418_v30 = vld [vmem:[%s4243_s18 + $0x204] ss:$16 sps:$4 sm:$0xff]   ;;  %v3421_v32 = vld [vmem:[%s4243_s18 + $0x200] ss:$16 sps:$4 sm:$0xff]  }
  0xa4   : > { %2024 = vmatprep.subr.bf16.mxu1 %v3400_v18  ;;  %v3422_v33 = vld [vmem:[%s4243_s18 + $0x1e4] ss:$16 sps:$4 sm:$0xff]   ;;  %v3426_v35 = vld [vmem:[%s4243_s18 + $0x1e0] ss:$16 sps:$4 sm:$0xff]  }
  0xa5   : > { %v3424_v34 = vld [vmem:[%s4243_s18 + $0x3e4] ss:$16 sps:$4 sm:$0xff]   ;;  %v3427_v36 = vld [vmem:[%s4243_s18 + $0x3e0] ss:$16 sps:$4 sm:$0xff]  }
  0xa6   : > { %1984 = vmatpush1.bf16.msra.mxu0 %v3402_v19  ;;  %v3428_v37 = vld [vmem:[%s4243_s18 + $0x1c4] ss:$16 sps:$4 sm:$0xff]   ;;  %v3432_v39 = vld [vmem:[%s4243_s18 + $0x1c0] ss:$16 sps:$4 sm:$0xff]  }
  0xa7   : > { %2025 = vmatpush1.bf16.msra.mxu1 %v3403_v20  ;;  %1985 = vmatprep.subr.bf16.mxu0 %v3404_v21  ;;  %v3430_v38 = vld [vmem:[%s4243_s18 + $0x3c4] ss:$16 sps:$4 sm:$0xff]   ;;  %v3433_v40 = vld [vmem:[%s4243_s18 + $0x3c0] ss:$16 sps:$4 sm:$0xff]  }
  0xa8   : > { %2026 = vmatprep.subr.bf16.mxu1 %v3406_v22  ;;  %v3434_v41 = vld [vmem:[%s4243_s18 + $0x1a4] ss:$16 sps:$4 sm:$0xff]   ;;  %v3438_v43 = vld [vmem:[%s4243_s18 + $0x1a0] ss:$16 sps:$4 sm:$0xff]  }
  0xa9   : > { %v3436_v42 = vld [vmem:[%s4243_s18 + $0x3a4] ss:$16 sps:$4 sm:$0xff]   ;;  %v3439_v44 = vld [vmem:[%s4243_s18 + $0x3a0] ss:$16 sps:$4 sm:$0xff]  }
  0xaa   : > { %1986 = vmatpush1.bf16.msra.mxu0 %v3408_v23  ;;  %v3440_v45 = vld [vmem:[%s4243_s18 + $0x184] ss:$16 sps:$4 sm:$0xff]   ;;  %v3444_v50 = vld [vmem:[%s4243_s18 + $0x180] ss:$16 sps:$4 sm:$0xff]  }
  0xab   : > { %2027 = vmatpush1.bf16.msra.mxu1 %v3409_v24  ;;  %1987 = vmatprep.subr.bf16.mxu0 %v3410_v25  ;;  %v3442_v46 = vld [vmem:[%s4243_s18 + $0x384] ss:$16 sps:$4 sm:$0xff]   ;;  %v3445_v51 = vld [vmem:[%s4243_s18 + $0x380] ss:$16 sps:$4 sm:$0xff]  }
  0xac   : > { %2028 = vmatprep.subr.bf16.mxu1 %v3412_v26  ;;  %v387_v49 = vld [vmem:[%s4643_s0 + $0x8] sm:$0xff] }
  0xad   : > { %v4325_v52 = vcombine.high %v387_v49, %v387_v49  ;;  %v3446_v53 = vld [vmem:[%s4243_s18 + $0x164] ss:$16 sps:$4 sm:$0xff]   ;;  %v3450_v55 = vld [vmem:[%s4243_s18 + $0x160] ss:$16 sps:$4 sm:$0xff]   ;;  %v4349_v8 = vcombine.low %v387_v49, %v387_v49 }
  0xae   : > { %1988 = vmatpush1.bf16.msra.mxu0 %v3414_v27  ;;  %v3448_v54 = vld [vmem:[%s4243_s18 + $0x364] ss:$16 sps:$4 sm:$0xff]   ;;  %v3451_v56 = vld [vmem:[%s4243_s18 + $0x360] ss:$16 sps:$4 sm:$0xff]  }
  0xaf   : > { %2029 = vmatpush1.bf16.msra.mxu1 %v3415_v28  ;;  %1989 = vmatprep.subr.bf16.mxu0 %v3416_v29  ;;  %v3452_v57 = vld [vmem:[%s4243_s18 + $0x144] ss:$16 sps:$4 sm:$0xff]   ;;  %v3456_v59 = vld [vmem:[%s4243_s18 + $0x140] ss:$16 sps:$4 sm:$0xff]  }
  0xb0   : > { %2030 = vmatprep.subr.bf16.mxu1 %v3418_v30  ;;  %2048 = vmatprep.mubr.bf16.mxu1 %v4325_v52  ;;  %v3454_v58 = vld [vmem:[%s4243_s18 + $0x344] ss:$16 sps:$4 sm:$0xff]   ;;  %v3457_v60 = vld [vmem:[%s4243_s18 + $0x340] ss:$16 sps:$4 sm:$0xff]  }
  0xb1   : > { %v3458_v61 = vld [vmem:[%s4243_s18 + $0x124] ss:$16 sps:$4 sm:$0xff]   ;;  %v3462_v63 = vld [vmem:[%s4243_s18 + $0x120] ss:$16 sps:$4 sm:$0xff]  }
  0xb2   : > { %1990 = vmatpush1.bf16.msra.mxu0 %v3420_v31  ;;  %v3460_v62 = vld [vmem:[%s4243_s18 + $0x324] ss:$16 sps:$4 sm:$0xff]   ;;  %v3463_v0 = vld [vmem:[%s4243_s18 + $0x320] ss:$16 sps:$4 sm:$0xff]  }
  0xb3   : > { %2031 = vmatpush1.bf16.msra.mxu1 %v3421_v32  ;;  %1991 = vmatprep.subr.bf16.mxu0 %v3422_v33  ;;  %v3464_v1 = vld [vmem:[%s4243_s18 + $0x104] ss:$16 sps:$4 sm:$0xff]   ;;  %v3468_v3 = vld [vmem:[%s4243_s18 + $0x100] ss:$16 sps:$4 sm:$0xff]   ;;  %v4380_v33 = vld [vmem:[%s4643_s0 + $0x10] sm:$0xff] }
  0xb4   : > { %2032 = vmatprep.subr.bf16.mxu1 %v3424_v34  ;;  %v3466_v2 = vld [vmem:[%s4243_s18 + $0x304] ss:$16 sps:$4 sm:$0xff]   ;;  %v3469_v4 = vld [vmem:[%s4243_s18 + $0x300] ss:$16 sps:$4 sm:$0xff]  }
  0xb5   : > { %v3476_v5 = vld [vmem:[%s4243_s18 + $0x4e4] ss:$16 sps:$4 sm:$0xff]   ;;  %v3474_v9 = vld [vmem:[%s4243_s18 + $0x4e0] ss:$16 sps:$4 sm:$0xff]  }
  0xb6   : > { %1992 = vmatpush2.bf16.msra.mxu0 %v3426_v35  ;;  %v3479_v6 = vld [vmem:[%s4243_s18 + $0x6e4] ss:$16 sps:$4 sm:$0xff]   ;;  %v3477_v10 = vld [vmem:[%s4243_s18 + $0x6e0] ss:$16 sps:$4 sm:$0xff]  }
  0xb7   : > { %2033 = vmatpush2.bf16.msra.mxu1 %v3427_v36  ;;  %1993 = vmatprep.subr.bf16.mxu0 %v3428_v37  ;;  %v3482_v11 = vld [vmem:[%s4243_s18 + $0x4c4] ss:$16 sps:$4 sm:$0xff]   ;;  %v3480_v13 = vld [vmem:[%s4243_s18 + $0x4c0] ss:$16 sps:$4 sm:$0xff]   ;;  %v4391_v37 = vcombine.high %v4380_v33, %v4380_v33 }
  0xb8   : > { %2034 = vmatprep.subr.bf16.mxu1 %v3430_v38  ;;  %v3485_v12 = vld [vmem:[%s4243_s18 + $0x6c4] ss:$16 sps:$4 sm:$0xff]   ;;  %v3483_v14 = vld [vmem:[%s4243_s18 + $0x6c0] ss:$16 sps:$4 sm:$0xff]  }
  0xb9   : > { %v3488_v15 = vld [vmem:[%s4243_s18 + $0x4a4] ss:$16 sps:$4 sm:$0xff]   ;;  %v3486_v17 = vld [vmem:[%s4243_s18 + $0x4a0] ss:$16 sps:$4 sm:$0xff]  }
  0xba   : > { %1994 = vmatpush2.bf16.msra.mxu0 %v3432_v39  ;;  %v3491_v16 = vld [vmem:[%s4243_s18 + $0x6a4] ss:$16 sps:$4 sm:$0xff]   ;;  %v3489_v18 = vld [vmem:[%s4243_s18 + $0x6a0] ss:$16 sps:$4 sm:$0xff]  }
  0xbb   : > { %2035 = vmatpush2.bf16.msra.mxu1 %v3433_v40  ;;  %1995 = vmatprep.subr.bf16.mxu0 %v3434_v41  ;;  %v3494_v19 = vld [vmem:[%s4243_s18 + $0x484] ss:$16 sps:$4 sm:$0xff]   ;;  %v3492_v21 = vld [vmem:[%s4243_s18 + $0x480] ss:$16 sps:$4 sm:$0xff]  }
  0xbc   : > { %2036 = vmatprep.subr.bf16.mxu1 %v3436_v42  ;;  %v3497_v20 = vld [vmem:[%s4243_s18 + $0x684] ss:$16 sps:$4 sm:$0xff]   ;;  %v3495_v22 = vld [vmem:[%s4243_s18 + $0x680] ss:$16 sps:$4 sm:$0xff]  }
  0xbd   : > { %v3500_v23 = vld [vmem:[%s4243_s18 + $0x464] ss:$16 sps:$4 sm:$0xff]   ;;  %v3498_v25 = vld [vmem:[%s4243_s18 + $0x460] ss:$16 sps:$4 sm:$0xff]  }
  0xbe   : > { %1996 = vmatpush2.bf16.msra.mxu0 %v3438_v43  ;;  %v3503_v24 = vld [vmem:[%s4243_s18 + $0x664] ss:$16 sps:$4 sm:$0xff]   ;;  %v3501_v26 = vld [vmem:[%s4243_s18 + $0x660] ss:$16 sps:$4 sm:$0xff]  }
  0xbf   : > { %2037 = vmatpush2.bf16.msra.mxu1 %v3439_v44  ;;  %1997 = vmatprep.subr.bf16.mxu0 %v3440_v45  ;;  %v3506_v27 = vld [vmem:[%s4243_s18 + $0x444] ss:$16 sps:$4 sm:$0xff]   ;;  %v3504_v29 = vld [vmem:[%s4243_s18 + $0x440] ss:$16 sps:$4 sm:$0xff]  }
  0xc0   : > { %2038 = vmatprep.subr.bf16.mxu1 %v3442_v46  ;;  %v3509_v28 = vld [vmem:[%s4243_s18 + $0x644] ss:$16 sps:$4 sm:$0xff]   ;;  %v3507_v30 = vld [vmem:[%s4243_s18 + $0x640] ss:$16 sps:$4 sm:$0xff]  }
  0xc1   : > { %v3512_v31 = vld [vmem:[%s4243_s18 + $0x424] ss:$16 sps:$4 sm:$0xff]   ;;  %v3510_v35 = vld [vmem:[%s4243_s18 + $0x420] ss:$16 sps:$4 sm:$0xff]  }
  0xc2   : > { %1998 = vmatpush2.bf16.msra.mxu0 %v3444_v50  ;;  %v3515_v32 = vld [vmem:[%s4243_s18 + $0x624] ss:$16 sps:$4 sm:$0xff]   ;;  %v3513_v36 = vld [vmem:[%s4243_s18 + $0x620] ss:$16 sps:$4 sm:$0xff]  }
  0xc3   : > { %2039 = vmatpush2.bf16.msra.mxu1 %v3445_v51  ;;  %1999 = vmatprep.subr.bf16.mxu0 %v3446_v53  ;;  %v4385_v34 = vld [vmem:[%s4643_s0 + $0x18] sm:$0xff] }
  0xc4   : > { %2040 = vmatprep.subr.bf16.mxu1 %v3448_v54  ;;  %v4395_v38 = vcombine.high %v4385_v34, %v4385_v34  ;;  %v3518_v39 = vld [vmem:[%s4243_s18 + $0x404] ss:$16 sps:$4 sm:$0xff]   ;;  %v3516_v41 = vld [vmem:[%s4243_s18 + $0x400] ss:$16 sps:$4 sm:$0xff]  }
  0xc5   : > { %v3521_v40 = vld [vmem:[%s4243_s18 + $0x604] ss:$16 sps:$4 sm:$0xff]   ;;  %v3519_v42 = vld [vmem:[%s4243_s18 + $0x600] ss:$16 sps:$4 sm:$0xff]  }
  0xc6   : > { %2000 = vmatpush2.bf16.msra.mxu0 %v3450_v55  ;;  %v3524_v43 = vld [vmem:[%s4243_s18 + $0x5e4] ss:$16 sps:$4 sm:$0xff]   ;;  %v3522_v45 = vld [vmem:[%s4243_s18 + $0x5e0] ss:$16 sps:$4 sm:$0xff]  }
  0xc7   : > { %2041 = vmatpush2.bf16.msra.mxu1 %v3451_v56  ;;  %2001 = vmatprep.subr.bf16.mxu0 %v3452_v57  ;;  %v3527_v44 = vld [vmem:[%s4243_s18 + $0x7e4] ss:$16 sps:$4 sm:$0xff]   ;;  %v3525_v46 = vld [vmem:[%s4243_s18 + $0x7e0] ss:$16 sps:$4 sm:$0xff]  }
  0xc8   : > { %2042 = vmatprep.subr.bf16.mxu1 %v3454_v58  ;;  %v3530_v47 = vld [vmem:[%s4243_s18 + $0x5c4] ss:$16 sps:$4 sm:$0xff]   ;;  %v3528_v50 = vld [vmem:[%s4243_s18 + $0x5c0] ss:$16 sps:$4 sm:$0xff]  }
  0xc9   : > { %v3533_v49 = vld [vmem:[%s4243_s18 + $0x7c4] ss:$16 sps:$4 sm:$0xff]   ;;  %v3531_v51 = vld [vmem:[%s4243_s18 + $0x7c0] ss:$16 sps:$4 sm:$0xff]  }
  0xca   : > { %2002 = vmatpush2.bf16.msra.mxu0 %v3456_v59  ;;  %v3536_v53 = vld [vmem:[%s4243_s18 + $0x5a4] ss:$16 sps:$4 sm:$0xff]   ;;  %v3534_v55 = vld [vmem:[%s4243_s18 + $0x5a0] ss:$16 sps:$4 sm:$0xff]  }
  0xcb   : > { %2043 = vmatpush2.bf16.msra.mxu1 %v3457_v60  ;;  %2003 = vmatprep.subr.bf16.mxu0 %v3458_v61  ;;  %v3539_v54 = vld [vmem:[%s4243_s18 + $0x7a4] ss:$16 sps:$4 sm:$0xff]   ;;  %v3537_v56 = vld [vmem:[%s4243_s18 + $0x7a0] ss:$16 sps:$4 sm:$0xff]  }
  0xcc   : > { %2044 = vmatprep.subr.bf16.mxu1 %v3460_v62  ;;  %v3542_v57 = vld [vmem:[%s4243_s18 + $0x584] ss:$16 sps:$4 sm:$0xff]   ;;  %v3540_v59 = vld [vmem:[%s4243_s18 + $0x580] ss:$16 sps:$4 sm:$0xff]  }
  0xcd   : > { %v3545_v58 = vld [vmem:[%s4243_s18 + $0x784] ss:$16 sps:$4 sm:$0xff]   ;;  %v3543_v60 = vld [vmem:[%s4243_s18 + $0x780] ss:$16 sps:$4 sm:$0xff]  }
  0xce   : > { %2004 = vmatpush2.bf16.msra.mxu0 %v3462_v63  ;;  %v3548_v61 = vld [vmem:[%s4243_s18 + $0x564] ss:$16 sps:$4 sm:$0xff]   ;;  %v3546_v63 = vld [vmem:[%s4243_s18 + $0x560] ss:$16 sps:$4 sm:$0xff]  }
  0xcf   : > { %2045 = vmatpush2.bf16.msra.mxu1 %v3463_v0  ;;  %2005 = vmatprep.subr.bf16.mxu0 %v3464_v1  ;;  %v3551_v62 = vld [vmem:[%s4243_s18 + $0x764] ss:$16 sps:$4 sm:$0xff]   ;;  %v3549_v0 = vld [vmem:[%s4243_s18 + $0x760] ss:$16 sps:$4 sm:$0xff]  }
  0xd0   : > { %2046 = vmatprep.subr.bf16.mxu1 %v3466_v2  ;;  %v3554_v1 = vld [vmem:[%s4243_s18 + $0x544] ss:$16 sps:$4 sm:$0xff]  }
  0xd1   : > { %v3557_v2 = vld [vmem:[%s4243_s18 + $0x744] ss:$16 sps:$4 sm:$0xff]  }
  0xd2   : > { %2006 = vmatpush2.bf16.msra.mxu0 %v3468_v3  ;;  %v3552_v3 = vld [vmem:[%s4243_s18 + $0x540] ss:$16 sps:$4 sm:$0xff]  }
  0xd3   : > { %2047 = vmatpush2.bf16.msra.mxu1 %v3469_v4  ;;  %2057 = vmatprep.subr.bf16.mxu0 %v3476_v5  ;;  %v3555_v4 = vld [vmem:[%s4243_s18 + $0x740] ss:$16 sps:$4 sm:$0xff]   ;;  %v3560_v5 = vld [vmem:[%s4243_s18 + $0x524] ss:$16 sps:$4 sm:$0xff]  }
  0xd4   : > { %2098 = vmatprep.subr.bf16.mxu1 %v3479_v6  ;;  %v3563_v6 = vld [vmem:[%s4243_s18 + $0x724] ss:$16 sps:$4 sm:$0xff]  }
  0xd5   : > { %2008 = vmatmul.mubr.bf16.vlgmr.msra.gmra.mxu0 %v4347_v7 }
  0xd6   : > { %2049 = vmatmul.mubr.bf16.vlgmr.msra.gmra.mxu1 %v4349_v8  ;;  %2058 = vmatpush1.bf16.msra.mxu0 %v3474_v9  ;;  %v3558_v9 = vld [vmem:[%s4243_s18 + $0x520] ss:$16 sps:$4 sm:$0xff]  }
  0xd7   : > { %2099 = vmatpush1.bf16.msra.mxu1 %v3477_v10  ;;  %2059 = vmatprep.subr.bf16.mxu0 %v3482_v11  ;;  %v3561_v10 = vld [vmem:[%s4243_s18 + $0x720] ss:$16 sps:$4 sm:$0xff]   ;;  %v3566_v11 = vld [vmem:[%s4243_s18 + $0x504] ss:$16 sps:$4 sm:$0xff]  }
  0xd8   : > { %2100 = vmatprep.subr.bf16.mxu1 %v3485_v12  ;;  %2089 = vmatprep.mubr.bf16.mxu0 %v4391_v37  ;;  %v3569_v12 = vld [vmem:[%s4243_s18 + $0x704] ss:$16 sps:$4 sm:$0xff]  }
  0xd9   : > { %2130 = vmatprep.mubr.bf16.mxu1 %v4395_v38 }
  0xda   : > { %2060 = vmatpush1.bf16.msra.mxu0 %v3480_v13  ;;  %v3564_v13 = vld [vmem:[%s4243_s18 + $0x500] ss:$16 sps:$4 sm:$0xff]  }
  0xdb   : > { %2101 = vmatpush1.bf16.msra.mxu1 %v3483_v14  ;;  %2061 = vmatprep.subr.bf16.mxu0 %v3488_v15  ;;  %v3567_v14 = vld [vmem:[%s4243_s18 + $0x700] ss:$16 sps:$4 sm:$0xff]   ;;  %v3576_v15 = vld [vmem:[%s4243_s18 + $0xec] ss:$16 sps:$4 sm:$0xff]  }
  0xdc   : > { %2102 = vmatprep.subr.bf16.mxu1 %v3491_v16  ;;  %v3579_v16 = vld [vmem:[%s4243_s18 + $0x2ec] ss:$16 sps:$4 sm:$0xff]  }
  0xde   : > { %2062 = vmatpush1.bf16.msra.mxu0 %v3486_v17  ;;  %v4439_v17 = vcombine.low %v4380_v33, %v4380_v33  ;;  %v3598_v33 = vld [vmem:[%s4243_s18 + $0x68] ss:$16 sps:$4 sm:$0xff]  }
  0xdf   : > { %2103 = vmatpush1.bf16.msra.mxu1 %v3489_v18  ;;  %2063 = vmatprep.subr.bf16.mxu0 %v3494_v19  ;;  %v4443_v18 = vcombine.low %v4385_v34, %v4385_v34  ;;  %v3574_v19 = vld [vmem:[%s4243_s18 + $0xe8] ss:$16 sps:$4 sm:$0xff]  }
  0xe0   : > { %2104 = vmatprep.subr.bf16.mxu1 %v3497_v20  ;;  %v3577_v20 = vld [vmem:[%s4243_s18 + $0x2e8] ss:$16 sps:$4 sm:$0xff]  }
  0xe1   : > { %v3601_v34 = vld [vmem:[%s4243_s18 + $0x268] ss:$16 sps:$4 sm:$0xff]  }
  0xe2   : > { %2064 = vmatpush1.bf16.msra.mxu0 %v3492_v21  ;;  %v3582_v21 = vld [vmem:[%s4243_s18 + $0xcc] ss:$16 sps:$4 sm:$0xff]  }
  0xe3   : > { %2105 = vmatpush1.bf16.msra.mxu1 %v3495_v22  ;;  %2065 = vmatprep.subr.bf16.mxu0 %v3500_v23  ;;  %v3585_v22 = vld [vmem:[%s4243_s18 + $0x2cc] ss:$16 sps:$4 sm:$0xff]   ;;  %v3580_v23 = vld [vmem:[%s4243_s18 + $0xc8] ss:$16 sps:$4 sm:$0xff]  }
  0xe4   : > { %2106 = vmatprep.subr.bf16.mxu1 %v3503_v24  ;;  %v3583_v24 = vld [vmem:[%s4243_s18 + $0x2c8] ss:$16 sps:$4 sm:$0xff]  }
  0xe6   : > { %2066 = vmatpush1.bf16.msra.mxu0 %v3498_v25  ;;  %v3588_v25 = vld [vmem:[%s4243_s18 + $0xac] ss:$16 sps:$4 sm:$0xff]  }
  0xe7   : > { %2107 = vmatpush1.bf16.msra.mxu1 %v3501_v26  ;;  %2067 = vmatprep.subr.bf16.mxu0 %v3506_v27  ;;  %v3591_v26 = vld [vmem:[%s4243_s18 + $0x2ac] ss:$16 sps:$4 sm:$0xff]   ;;  %v3586_v27 = vld [vmem:[%s4243_s18 + $0xa8] ss:$16 sps:$4 sm:$0xff]  }
  0xe8   : > { %2108 = vmatprep.subr.bf16.mxu1 %v3509_v28  ;;  %v3589_v28 = vld [vmem:[%s4243_s18 + $0x2a8] ss:$16 sps:$4 sm:$0xff]  }
  0xea   : > { %2068 = vmatpush1.bf16.msra.mxu0 %v3504_v29  ;;  %v3594_v29 = vld [vmem:[%s4243_s18 + $0x8c] ss:$16 sps:$4 sm:$0xff]  }
  0xeb   : > { %2109 = vmatpush1.bf16.msra.mxu1 %v3507_v30  ;;  %2069 = vmatprep.subr.bf16.mxu0 %v3512_v31  ;;  %v3597_v30 = vld [vmem:[%s4243_s18 + $0x28c] ss:$16 sps:$4 sm:$0xff]   ;;  %v3592_v31 = vld [vmem:[%s4243_s18 + $0x88] ss:$16 sps:$4 sm:$0xff]  }
  0xec   : > { %2110 = vmatprep.subr.bf16.mxu1 %v3515_v32  ;;  %v3595_v32 = vld [vmem:[%s4243_s18 + $0x288] ss:$16 sps:$4 sm:$0xff]  }
  0xee   : > { %2070 = vmatpush1.bf16.msra.mxu0 %v3510_v35  ;;  %v3606_v35 = vld [vmem:[%s4243_s18 + $0x4c] ss:$16 sps:$4 sm:$0xff]  }
  0xef   : > { %2111 = vmatpush1.bf16.msra.mxu1 %v3513_v36  ;;  %2071 = vmatprep.subr.bf16.mxu0 %v3518_v39  ;;  %v3609_v36 = vld [vmem:[%s4243_s18 + $0x24c] ss:$16 sps:$4 sm:$0xff]   ;;  %v3604_v39 = vld [vmem:[%s4243_s18 + $0x48] ss:$16 sps:$4 sm:$0xff]  }
  0xf0   : > { %2112 = vmatprep.subr.bf16.mxu1 %v3521_v40  ;;  %v3607_v40 = vld [vmem:[%s4243_s18 + $0x248] ss:$16 sps:$4 sm:$0xff]  }
  0xf2   : > { %2072 = vmatpush1.bf16.msra.mxu0 %v3516_v41  ;;  %v3612_v41 = vld [vmem:[%s4243_s18 + $0x2c] ss:$16 sps:$4 sm:$0xff]  }
  0xf3   : > { %2113 = vmatpush1.bf16.msra.mxu1 %v3519_v42  ;;  %2073 = vmatprep.subr.bf16.mxu0 %v3524_v43  ;;  %v3615_v42 = vld [vmem:[%s4243_s18 + $0x22c] ss:$16 sps:$4 sm:$0xff]   ;;  %v3610_v43 = vld [vmem:[%s4243_s18 + $0x28] ss:$16 sps:$4 sm:$0xff]  }
  0xf4   : > { %2114 = vmatprep.subr.bf16.mxu1 %v3527_v44  ;;  %v3613_v44 = vld [vmem:[%s4243_s18 + $0x228] ss:$16 sps:$4 sm:$0xff]  }
  0xf6   : > { %2074 = vmatpush2.bf16.msra.mxu0 %v3522_v45  ;;  %v3618_v45 = vld [vmem:[%s4243_s18 + $0xc] ss:$16 sps:$4 sm:$0xff]  }
  0xf7   : > { %2115 = vmatpush2.bf16.msra.mxu1 %v3525_v46  ;;  %2075 = vmatprep.subr.bf16.mxu0 %v3530_v47  ;;  %v3621_v46 = vld [vmem:[%s4243_s18 + $0x20c] ss:$16 sps:$4 sm:$0xff]   ;;  %v3616_v47 = vld [vmem:[%s4243_s18 + $0x8] ss:$16 sps:$4 sm:$0xff]  }
  0xf8   : > { %2116 = vmatprep.subr.bf16.mxu1 %v3533_v49  ;;  %v3619_v49 = vld [vmem:[%s4243_s18 + $0x208] ss:$16 sps:$4 sm:$0xff]  }
  0xfa   : > { %2076 = vmatpush2.bf16.msra.mxu0 %v3528_v50  ;;  %v3624_v50 = vld [vmem:[%s4243_s18 + $0x1ec] ss:$16 sps:$4 sm:$0xff]  }
  0xfb   : > { %2117 = vmatpush2.bf16.msra.mxu1 %v3531_v51  ;;  %2077 = vmatprep.subr.bf16.mxu0 %v3536_v53  ;;  %v3627_v51 = vld [vmem:[%s4243_s18 + $0x3ec] ss:$16 sps:$4 sm:$0xff]   ;;  %v3622_v53 = vld [vmem:[%s4243_s18 + $0x1e8] ss:$16 sps:$4 sm:$0xff]  }
  0xfc   : > { %2118 = vmatprep.subr.bf16.mxu1 %v3539_v54  ;;  %v3625_v54 = vld [vmem:[%s4243_s18 + $0x3e8] ss:$16 sps:$4 sm:$0xff]  }
  0xfe   : > { %2078 = vmatpush2.bf16.msra.mxu0 %v3534_v55  ;;  %v3630_v55 = vld [vmem:[%s4243_s18 + $0x1cc] ss:$16 sps:$4 sm:$0xff]  }
  0xff   : > { %2119 = vmatpush2.bf16.msra.mxu1 %v3537_v56  ;;  %2079 = vmatprep.subr.bf16.mxu0 %v3542_v57  ;;  %v3633_v56 = vld [vmem:[%s4243_s18 + $0x3cc] ss:$16 sps:$4 sm:$0xff]   ;;  %v3628_v57 = vld [vmem:[%s4243_s18 + $0x1c8] ss:$16 sps:$4 sm:$0xff]  }
 0x100   : > { %2120 = vmatprep.subr.bf16.mxu1 %v3545_v58  ;;  %v3631_v58 = vld [vmem:[%s4243_s18 + $0x3c8] ss:$16 sps:$4 sm:$0xff]  }
 0x102   : > { %2080 = vmatpush2.bf16.msra.mxu0 %v3540_v59  ;;  %v3636_v59 = vld [vmem:[%s4243_s18 + $0x1ac] ss:$16 sps:$4 sm:$0xff]  }
 0x103   : > { %2121 = vmatpush2.bf16.msra.mxu1 %v3543_v60  ;;  %2081 = vmatprep.subr.bf16.mxu0 %v3548_v61  ;;  %v3639_v60 = vld [vmem:[%s4243_s18 + $0x3ac] ss:$16 sps:$4 sm:$0xff]   ;;  %v3634_v61 = vld [vmem:[%s4243_s18 + $0x1a8] ss:$16 sps:$4 sm:$0xff]  }
 0x104   : > { %2122 = vmatprep.subr.bf16.mxu1 %v3551_v62  ;;  %v3637_v62 = vld [vmem:[%s4243_s18 + $0x3a8] ss:$16 sps:$4 sm:$0xff]  }
 0x106   : > { %2082 = vmatpush2.bf16.msra.mxu0 %v3546_v63  ;;  %v3642_v63 = vld [vmem:[%s4243_s18 + $0x18c] ss:$16 sps:$4 sm:$0xff]  }
 0x107   : > { %2123 = vmatpush2.bf16.msra.mxu1 %v3549_v0  ;;  %2083 = vmatprep.subr.bf16.mxu0 %v3554_v1  ;;  %v3645_v0 = vld [vmem:[%s4243_s18 + $0x38c] ss:$16 sps:$4 sm:$0xff]   ;;  %v3640_v1 = vld [vmem:[%s4243_s18 + $0x188] ss:$16 sps:$4 sm:$0xff]  }
 0x108   : > { %2124 = vmatprep.subr.bf16.mxu1 %v3557_v2  ;;  %v3643_v2 = vld [vmem:[%s4243_s18 + $0x388] ss:$16 sps:$4 sm:$0xff]  }
 0x10a   : > { %2084 = vmatpush2.bf16.msra.mxu0 %v3552_v3  ;;  %v3648_v3 = vld [vmem:[%s4243_s18 + $0x16c] ss:$16 sps:$4 sm:$0xff]  }
 0x10b   : > { %2125 = vmatpush2.bf16.msra.mxu1 %v3555_v4  ;;  %2085 = vmatprep.subr.bf16.mxu0 %v3560_v5  ;;  %v3651_v4 = vld [vmem:[%s4243_s18 + $0x36c] ss:$16 sps:$4 sm:$0xff]   ;;  %v3646_v5 = vld [vmem:[%s4243_s18 + $0x168] ss:$16 sps:$4 sm:$0xff]  }
 0x10c   : > { %2126 = vmatprep.subr.bf16.mxu1 %v3563_v6  ;;  %v3649_v6 = vld [vmem:[%s4243_s18 + $0x368] ss:$16 sps:$4 sm:$0xff]  }
 0x10e   : > { %2086 = vmatpush2.bf16.msra.mxu0 %v3558_v9  ;;  %v3654_v9 = vld [vmem:[%s4243_s18 + $0x14c] ss:$16 sps:$4 sm:$0xff]  }
 0x10f   : > { %2127 = vmatpush2.bf16.msra.mxu1 %v3561_v10  ;;  %2087 = vmatprep.subr.bf16.mxu0 %v3566_v11  ;;  %v3657_v10 = vld [vmem:[%s4243_s18 + $0x34c] ss:$16 sps:$4 sm:$0xff]   ;;  %v3652_v11 = vld [vmem:[%s4243_s18 + $0x148] ss:$16 sps:$4 sm:$0xff]  }
 0x110   : > { %2128 = vmatprep.subr.bf16.mxu1 %v3569_v12  ;;  %v3655_v12 = vld [vmem:[%s4243_s18 + $0x348] ss:$16 sps:$4 sm:$0xff]  }
 0x112   : > { %2088 = vmatpush2.bf16.msra.mxu0 %v3564_v13  ;;  %v3660_v13 = vld [vmem:[%s4243_s18 + $0x12c] ss:$16 sps:$4 sm:$0xff]  }
 0x113   : > { %2129 = vmatpush2.bf16.msra.mxu1 %v3567_v14  ;;  %2139 = vmatprep.subr.bf16.mxu0 %v3576_v15  ;;  %v3663_v14 = vld [vmem:[%s4243_s18 + $0x32c] ss:$16 sps:$4 sm:$0xff]   ;;  %v3658_v15 = vld [vmem:[%s4243_s18 + $0x128] ss:$16 sps:$4 sm:$0xff]  }
 0x114   : > { %2180 = vmatprep.subr.bf16.mxu1 %v3579_v16  ;;  %v3661_v16 = vld [vmem:[%s4243_s18 + $0x328] ss:$16 sps:$4 sm:$0xff]  }
 0x115   : > { %2090 = vmatmul.mubr.bf16.vlgmr.msra.gmra.mxu0 %v4439_v17 }
 0x116   : > { %2131 = vmatmul.mubr.bf16.vlgmr.msra.gmra.mxu1 %v4443_v18  ;;  %2140 = vmatpush1.bf16.msra.mxu0 %v3574_v19  ;;  %v3666_v19 = vld [vmem:[%s4243_s18 + $0x10c] ss:$16 sps:$4 sm:$0xff]  }
 0x117   : > { %2181 = vmatpush1.bf16.msra.mxu1 %v3577_v20  ;;  %2141 = vmatprep.subr.bf16.mxu0 %v3582_v21  ;;  %v3669_v20 = vld [vmem:[%s4243_s18 + $0x30c] ss:$16 sps:$4 sm:$0xff]   ;;  %v3664_v21 = vld [vmem:[%s4243_s18 + $0x108] ss:$16 sps:$4 sm:$0xff]  }
 0x118   : > { %2182 = vmatprep.subr.bf16.mxu1 %v3585_v22  ;;  %2171 = vmatprep.mubr.bf16.mxu0 %v4318_v48  ;;  %v3600_v48 = vld [vmem:[%s4243_s18 + $0x6c] ss:$16 sps:$4 sm:$0xff]   ;;  %v3667_v22 = vld [vmem:[%s4243_s18 + $0x308] ss:$16 sps:$4 sm:$0xff]  }
 0x119   : > { %2212 = vmatprep.mubr.bf16.mxu1 %v4325_v52  ;;  %v3603_v52 = vld [vmem:[%s4243_s18 + $0x26c] ss:$16 sps:$4 sm:$0xff]  }
 0x11a   : > { %2142 = vmatpush1.bf16.msra.mxu0 %v3580_v23  ;;  %v3672_v23 = vld [vmem:[%s4243_s18 + $0x4ec] ss:$16 sps:$4 sm:$0xff]  }
 0x11b   : > { %2183 = vmatpush1.bf16.msra.mxu1 %v3583_v24  ;;  %2143 = vmatprep.subr.bf16.mxu0 %v3588_v25  ;;  %v3675_v24 = vld [vmem:[%s4243_s18 + $0x6ec] ss:$16 sps:$4 sm:$0xff]   ;;  %v3670_v25 = vld [vmem:[%s4243_s18 + $0x4e8] ss:$16 sps:$4 sm:$0xff]  }
 0x11c   : > { %2184 = vmatprep.subr.bf16.mxu1 %v3591_v26  ;;  %v3673_v26 = vld [vmem:[%s4243_s18 + $0x6e8] ss:$16 sps:$4 sm:$0xff]  }
 0x11e   : > { %2144 = vmatpush1.bf16.msra.mxu0 %v3586_v27  ;;  %v3678_v27 = vld [vmem:[%s4243_s18 + $0x4cc] ss:$16 sps:$4 sm:$0xff]  }
 0x11f   : > { %2185 = vmatpush1.bf16.msra.mxu1 %v3589_v28  ;;  %2145 = vmatprep.subr.bf16.mxu0 %v3594_v29  ;;  %v3681_v28 = vld [vmem:[%s4243_s18 + $0x6cc] ss:$16 sps:$4 sm:$0xff]   ;;  %v3676_v29 = vld [vmem:[%s4243_s18 + $0x4c8] ss:$16 sps:$4 sm:$0xff]  }
 0x120   : > { %2186 = vmatprep.subr.bf16.mxu1 %v3597_v30  ;;  %v3679_v30 = vld [vmem:[%s4243_s18 + $0x6c8] ss:$16 sps:$4 sm:$0xff]  }
 0x122   : > { %2146 = vmatpush1.bf16.msra.mxu0 %v3592_v31  ;;  %v3684_v31 = vld [vmem:[%s4243_s18 + $0x4ac] ss:$16 sps:$4 sm:$0xff]  }
 0x123   : > { %2187 = vmatpush1.bf16.msra.mxu1 %v3595_v32  ;;  %2147 = vmatprep.subr.bf16.mxu0 %v3600_v48  ;;  %v3687_v32 = vld [vmem:[%s4243_s18 + $0x6ac] ss:$16 sps:$4 sm:$0xff]  }
 0x124   : > { %2188 = vmatprep.subr.bf16.mxu1 %v3603_v52  ;;  %v3690_v48 = vld [vmem:[%s4243_s18 + $0x48c] ss:$16 sps:$4 sm:$0xff]  }
 0x125   : > { %v3693_v52 = vld [vmem:[%s4243_s18 + $0x68c] ss:$16 sps:$4 sm:$0xff]  }
 0x126   : > { %2148 = vmatpush1.bf16.msra.mxu0 %v3598_v33  ;;  %v3688_v33 = vld [vmem:[%s4243_s18 + $0x488] ss:$16 sps:$4 sm:$0xff]  }
 0x127   : > { %2189 = vmatpush1.bf16.msra.mxu1 %v3601_v34  ;;  %2149 = vmatprep.subr.bf16.mxu0 %v3606_v35  ;;  %v3699_v34 = vld [vmem:[%s4243_s18 + $0x66c] ss:$16 sps:$4 sm:$0xff]   ;;  %v3694_v35 = vld [vmem:[%s4243_s18 + $0x468] ss:$16 sps:$4 sm:$0xff]  }
 0x128   : > { %2190 = vmatprep.subr.bf16.mxu1 %v3609_v36  ;;  %v3697_v36 = vld [vmem:[%s4243_s18 + $0x668] ss:$16 sps:$4 sm:$0xff]  }
 0x12a   : > { %2150 = vmatpush1.bf16.msra.mxu0 %v3604_v39  ;;  %v3702_v39 = vld [vmem:[%s4243_s18 + $0x44c] ss:$16 sps:$4 sm:$0xff]  }
 0x12b   : > { %2191 = vmatpush1.bf16.msra.mxu1 %v3607_v40  ;;  %2151 = vmatprep.subr.bf16.mxu0 %v3612_v41  ;;  %v3705_v40 = vld [vmem:[%s4243_s18 + $0x64c] ss:$16 sps:$4 sm:$0xff]   ;;  %v3700_v41 = vld [vmem:[%s4243_s18 + $0x448] ss:$16 sps:$4 sm:$0xff]  }
 0x12c   : > { %2192 = vmatprep.subr.bf16.mxu1 %v3615_v42  ;;  %v3703_v42 = vld [vmem:[%s4243_s18 + $0x648] ss:$16 sps:$4 sm:$0xff]  }
 0x12e   : > { %2152 = vmatpush1.bf16.msra.mxu0 %v3610_v43  ;;  %v3708_v43 = vld [vmem:[%s4243_s18 + $0x42c] ss:$16 sps:$4 sm:$0xff]  }
 0x12f   : > { %2193 = vmatpush1.bf16.msra.mxu1 %v3613_v44  ;;  %2153 = vmatprep.subr.bf16.mxu0 %v3618_v45  ;;  %v3711_v44 = vld [vmem:[%s4243_s18 + $0x62c] ss:$16 sps:$4 sm:$0xff]   ;;  %v3706_v45 = vld [vmem:[%s4243_s18 + $0x428] ss:$16 sps:$4 sm:$0xff]  }
 0x130   : > { %2194 = vmatprep.subr.bf16.mxu1 %v3621_v46  ;;  %v3709_v46 = vld [vmem:[%s4243_s18 + $0x628] ss:$16 sps:$4 sm:$0xff]  }
 0x132   : > { %2154 = vmatpush1.bf16.msra.mxu0 %v3616_v47  ;;  %v3714_v47 = vld [vmem:[%s4243_s18 + $0x40c] ss:$16 sps:$4 sm:$0xff]  }
 0x133   : > { %2195 = vmatpush1.bf16.msra.mxu1 %v3619_v49  ;;  %2155 = vmatprep.subr.bf16.mxu0 %v3624_v50  ;;  %v3717_v49 = vld [vmem:[%s4243_s18 + $0x60c] ss:$16 sps:$4 sm:$0xff]   ;;  %v3712_v50 = vld [vmem:[%s4243_s18 + $0x408] ss:$16 sps:$4 sm:$0xff]  }
 0x134   : > { %2196 = vmatprep.subr.bf16.mxu1 %v3627_v51  ;;  %v3715_v51 = vld [vmem:[%s4243_s18 + $0x608] ss:$16 sps:$4 sm:$0xff]  }
 0x136   : > { %2156 = vmatpush2.bf16.msra.mxu0 %v3622_v53  ;;  %v3720_v53 = vld [vmem:[%s4243_s18 + $0x5ec] ss:$16 sps:$4 sm:$0xff]  }
 0x137   : > { %2197 = vmatpush2.bf16.msra.mxu1 %v3625_v54  ;;  %2157 = vmatprep.subr.bf16.mxu0 %v3630_v55  ;;  %v3723_v54 = vld [vmem:[%s4243_s18 + $0x7ec] ss:$16 sps:$4 sm:$0xff]   ;;  %v3718_v55 = vld [vmem:[%s4243_s18 + $0x5e8] ss:$16 sps:$4 sm:$0xff]  }
 0x138   : > { %2198 = vmatprep.subr.bf16.mxu1 %v3633_v56  ;;  %v3721_v56 = vld [vmem:[%s4243_s18 + $0x7e8] ss:$16 sps:$4 sm:$0xff]  }
 0x13a   : > { %2158 = vmatpush2.bf16.msra.mxu0 %v3628_v57  ;;  %v3726_v57 = vld [vmem:[%s4243_s18 + $0x5cc] ss:$16 sps:$4 sm:$0xff]  }
 0x13b   : > { %2199 = vmatpush2.bf16.msra.mxu1 %v3631_v58  ;;  %2159 = vmatprep.subr.bf16.mxu0 %v3636_v59  ;;  %v3729_v58 = vld [vmem:[%s4243_s18 + $0x7cc] ss:$16 sps:$4 sm:$0xff]   ;;  %v3724_v59 = vld [vmem:[%s4243_s18 + $0x5c8] ss:$16 sps:$4 sm:$0xff]  }
 0x13c   : > { %2200 = vmatprep.subr.bf16.mxu1 %v3639_v60  ;;  %v3727_v60 = vld [vmem:[%s4243_s18 + $0x7c8] ss:$16 sps:$4 sm:$0xff]  }
 0x13e   : > { %2160 = vmatpush2.bf16.msra.mxu0 %v3634_v61  ;;  %v3732_v61 = vld [vmem:[%s4243_s18 + $0x5ac] ss:$16 sps:$4 sm:$0xff]  }
 0x13f   : > { %2201 = vmatpush2.bf16.msra.mxu1 %v3637_v62  ;;  %2161 = vmatprep.subr.bf16.mxu0 %v3642_v63  ;;  %v3735_v62 = vld [vmem:[%s4243_s18 + $0x7ac] ss:$16 sps:$4 sm:$0xff]   ;;  %v3730_v63 = vld [vmem:[%s4243_s18 + $0x5a8] ss:$16 sps:$4 sm:$0xff]  }
 0x140   : > { %2202 = vmatprep.subr.bf16.mxu1 %v3645_v0  ;;  %v3733_v0 = vld [vmem:[%s4243_s18 + $0x7a8] ss:$16 sps:$4 sm:$0xff]  }
 0x142   : > { %2162 = vmatpush2.bf16.msra.mxu0 %v3640_v1  ;;  %v3738_v1 = vld [vmem:[%s4243_s18 + $0x58c] ss:$16 sps:$4 sm:$0xff]  }
 0x143   : > { %2203 = vmatpush2.bf16.msra.mxu1 %v3643_v2  ;;  %2163 = vmatprep.subr.bf16.mxu0 %v3648_v3  ;;  %v3741_v2 = vld [vmem:[%s4243_s18 + $0x78c] ss:$16 sps:$4 sm:$0xff]   ;;  %v3736_v3 = vld [vmem:[%s4243_s18 + $0x588] ss:$16 sps:$4 sm:$0xff]  }
 0x144   : > { %2204 = vmatprep.subr.bf16.mxu1 %v3651_v4  ;;  %v3739_v4 = vld [vmem:[%s4243_s18 + $0x788] ss:$16 sps:$4 sm:$0xff]  }
 0x146   : > { %2164 = vmatpush2.bf16.msra.mxu0 %v3646_v5  ;;  %v3744_v5 = vld [vmem:[%s4243_s18 + $0x56c] ss:$16 sps:$4 sm:$0xff]  }
 0x147   : > { %2205 = vmatpush2.bf16.msra.mxu1 %v3649_v6  ;;  %2165 = vmatprep.subr.bf16.mxu0 %v3654_v9  ;;  %v3747_v6 = vld [vmem:[%s4243_s18 + $0x76c] ss:$16 sps:$4 sm:$0xff]   ;;  %v3742_v9 = vld [vmem:[%s4243_s18 + $0x568] ss:$16 sps:$4 sm:$0xff]  }
 0x148   : > { %2206 = vmatprep.subr.bf16.mxu1 %v3657_v10  ;;  %v3745_v10 = vld [vmem:[%s4243_s18 + $0x768] ss:$16 sps:$4 sm:$0xff]  }
 0x14a   : > { %2166 = vmatpush2.bf16.msra.mxu0 %v3652_v11  ;;  %v3750_v11 = vld [vmem:[%s4243_s18 + $0x54c] ss:$16 sps:$4 sm:$0xff]  }
 0x14b   : > { %2207 = vmatpush2.bf16.msra.mxu1 %v3655_v12  ;;  %2167 = vmatprep.subr.bf16.mxu0 %v3660_v13  ;;  %v3753_v12 = vld [vmem:[%s4243_s18 + $0x74c] ss:$16 sps:$4 sm:$0xff]   ;;  %v3748_v13 = vld [vmem:[%s4243_s18 + $0x548] ss:$16 sps:$4 sm:$0xff]  }
 0x14c   : > { %2208 = vmatprep.subr.bf16.mxu1 %v3663_v14  ;;  %v3751_v14 = vld [vmem:[%s4243_s18 + $0x748] ss:$16 sps:$4 sm:$0xff]  }
 0x14e   : > { %2168 = vmatpush2.bf16.msra.mxu0 %v3658_v15  ;;  %v3756_v15 = vld [vmem:[%s4243_s18 + $0x52c] ss:$16 sps:$4 sm:$0xff]  }
 0x14f   : > { %2209 = vmatpush2.bf16.msra.mxu1 %v3661_v16  ;;  %2169 = vmatprep.subr.bf16.mxu0 %v3666_v19  ;;  %v3759_v16 = vld [vmem:[%s4243_s18 + $0x72c] ss:$16 sps:$4 sm:$0xff]   ;;  %v3754_v19 = vld [vmem:[%s4243_s18 + $0x528] ss:$16 sps:$4 sm:$0xff]  }
 0x150   : > { %2210 = vmatprep.subr.bf16.mxu1 %v3669_v20  ;;  %v3757_v20 = vld [vmem:[%s4243_s18 + $0x728] ss:$16 sps:$4 sm:$0xff]  }
 0x152   : > { %2170 = vmatpush2.bf16.msra.mxu0 %v3664_v21  ;;  %v3762_v21 = vld [vmem:[%s4243_s18 + $0x50c] ss:$16 sps:$4 sm:$0xff]  }
 0x153   : > { %2211 = vmatpush2.bf16.msra.mxu1 %v3667_v22  ;;  %2221 = vmatprep.subr.bf16.mxu0 %v3672_v23  ;;  %v3765_v22 = vld [vmem:[%s4243_s18 + $0x70c] ss:$16 sps:$4 sm:$0xff]   ;;  %v3760_v23 = vld [vmem:[%s4243_s18 + $0x508] ss:$16 sps:$4 sm:$0xff]  }
 0x154   : > { %2262 = vmatprep.subr.bf16.mxu1 %v3675_v24  ;;  %v3763_v24 = vld [vmem:[%s4243_s18 + $0x708] ss:$16 sps:$4 sm:$0xff]  }
 0x155   : > { %2172 = vmatmul.mubr.bf16.vlgmr.msra.gmra.mxu0 %v4347_v7  ;;  %v3682_v7 = vld [vmem:[%s4243_s18 + $0x4a8] ss:$16 sps:$4 sm:$0xff]  }
 0x156   : > { %2213 = vmatmul.mubr.bf16.vlgmr.msra.gmra.mxu1 %v4349_v8  ;;  %2222 = vmatpush1.bf16.msra.mxu0 %v3670_v25  ;;  %v3685_v8 = vld [vmem:[%s4243_s18 + $0x6a8] ss:$16 sps:$4 sm:$0xff]   ;;  %v3766_v25 = vld [vmem:[%s4253_s16 + $0x78] sm:$0xff]  }
 0x157   : > { %2263 = vmatpush1.bf16.msra.mxu1 %v3673_v26  ;;  %2223 = vmatprep.subr.bf16.mxu0 %v3678_v27  ;;  %v3767_v26 = vld [vmem:[%s4253_s16 + $0x38] sm:$0xff]   ;;  %v3768_v27 = vld [vmem:[%s4253_s16 + $0x70] sm:$0xff]  }
 0x158   : > { %2264 = vmatprep.subr.bf16.mxu1 %v3681_v28  ;;  %2253 = vmatprep.mubr.bf16.mxu0 %v4391_v37  ;;  %v3691_v37 = vld [vmem:[%s4243_s18 + $0x688] ss:$16 sps:$4 sm:$0xff]  }
 0x159   : > { %2294 = vmatprep.mubr.bf16.mxu1 %v4395_v38  ;;  %v3696_v38 = vld [vmem:[%s4243_s18 + $0x46c] ss:$16 sps:$4 sm:$0xff]  }
 0x15a   : > { %2224 = vmatpush1.bf16.msra.mxu0 %v3676_v29 }
 0x15b   : > { %2265 = vmatpush1.bf16.msra.mxu1 %v3679_v30  ;;  %2225 = vmatprep.subr.bf16.mxu0 %v3684_v31  ;;  %v3769_v30 = vld [vmem:[%s4253_s16 + $0x30] sm:$0xff]  }
 0x15c   : > { %2266 = vmatprep.subr.bf16.mxu1 %v3687_v32 }
 0x15e   : > { %2226 = vmatpush1.bf16.msra.mxu0 %v3682_v7  ;;  %v3770_v7 = vld [vmem:[%s4253_s16 + $0x68] sm:$0xff]  }
 0x15f   : > { %2267 = vmatpush1.bf16.msra.mxu1 %v3685_v8  ;;  %2227 = vmatprep.subr.bf16.mxu0 %v3690_v48 }
 0x160   : > { %2268 = vmatprep.subr.bf16.mxu1 %v3693_v52  ;;  %v3772_v52 = vld [vmem:[%s4253_s16 + $0x60] sm:$0xff]  }
 0x162   : > { %2228 = vmatpush1.bf16.msra.mxu0 %v3688_v33 }
 0x163   : > { %2269 = vmatpush1.bf16.msra.mxu1 %v3691_v37  ;;  %2229 = vmatprep.subr.bf16.mxu0 %v3696_v38  ;;  %v3782_v37 = vld [vmem:[%s4253_s16 + $0xf8] sm:$0xff]  }
 0x164   : > { %2270 = vmatprep.subr.bf16.mxu1 %v3699_v34  ;;  %v3783_v38 = vld [vmem:[%s4253_s16 + $0xb8] sm:$0xff]   ;;  %v3784_v34 = vld [vmem:[%s4253_s16 + $0xf0] sm:$0xff]  }
 0x166   : > { %2230 = vmatpush1.bf16.msra.mxu0 %v3694_v35  ;;  %v3773_v35 = vld [vmem:[%s4253_s16 + $0x20] sm:$0xff]  }
 0x167   : > { %2271 = vmatpush1.bf16.msra.mxu1 %v3697_v36  ;;  %2231 = vmatprep.subr.bf16.mxu0 %v3702_v39  ;;  %v3785_v36 = vld [vmem:[%s4253_s16 + $0xb0] sm:$0xff]   ;;  %v3774_v39 = vld [vmem:[%s4253_s16 + $0x58] sm:$0xff]  }
 0x168   : > { %2272 = vmatprep.subr.bf16.mxu1 %v3705_v40  ;;  %v3786_v40 = vld [vmem:[%s4253_s16 + $0xe8] sm:$0xff]  }
 0x16a   : > { %2232 = vmatpush1.bf16.msra.mxu0 %v3700_v41  ;;  %v3775_v41 = vld [vmem:[%s4253_s16 + $0x18] sm:$0xff]  }
 0x16b   : > { %2273 = vmatpush1.bf16.msra.mxu1 %v3703_v42  ;;  %2233 = vmatprep.subr.bf16.mxu0 %v3708_v43  ;;  %v3787_v42 = vld [vmem:[%s4253_s16 + $0xa8] sm:$0xff]   ;;  %v3776_v43 = vld [vmem:[%s4253_s16 + $0x50] sm:$0xff]  }
 0x16c   : > { %2274 = vmatprep.subr.bf16.mxu1 %v3711_v44  ;;  %v3788_v44 = vld [vmem:[%s4253_s16 + $0xe0] sm:$0xff]  }
 0x16e   : > { %2234 = vmatpush1.bf16.msra.mxu0 %v3706_v45  ;;  %v3777_v45 = vld [vmem:[%s4253_s16 + $0x10] sm:$0xff]  }
 0x16f   : > { %2275 = vmatpush1.bf16.msra.mxu1 %v3709_v46  ;;  %2235 = vmatprep.subr.bf16.mxu0 %v3714_v47  ;;  %v3789_v46 = vld [vmem:[%s4253_s16 + $0xa0] sm:$0xff]   ;;  %v3778_v47 = vld [vmem:[%s4253_s16 + $0x48] sm:$0xff]  }
 0x170   : > { %2276 = vmatprep.subr.bf16.mxu1 %v3717_v49  ;;  %v3790_v49 = vld [vmem:[%s4253_s16 + $0xd8] sm:$0xff]  }
 0x172   : > { %2236 = vmatpush1.bf16.msra.mxu0 %v3712_v50  ;;  %v3779_v50 = vld [vmem:[%s4253_s16 + $0x8] sm:$0xff]  }
 0x173   : > { %2277 = vmatpush1.bf16.msra.mxu1 %v3715_v51  ;;  %2237 = vmatprep.subr.bf16.mxu0 %v3720_v53  ;;  %v3791_v51 = vld [vmem:[%s4253_s16 + $0x98] sm:$0xff]   ;;  %v3780_v53 = vld [vmem:[%s4253_s16 + $0x40] sm:$0xff]  }
 0x174   : > { %2278 = vmatprep.subr.bf16.mxu1 %v3723_v54  ;;  %v3781_v54 = vld [vmem:[%s4253_s16] sm:$0xff]  }
 0x176   : > { %2238 = vmatpush2.bf16.msra.mxu0 %v3718_v55  ;;  %v647_v55 = vlaneseq }
 0x177   : > { %2279 = vmatpush2.bf16.msra.mxu1 %v3721_v56  ;;  %2239 = vmatprep.subr.bf16.mxu0 %v3726_v57 }
 0x178   : > { %2280 = vmatprep.subr.bf16.mxu1 %v3729_v58  ;;  %v648_v56 = vshrl.u32 %v647_v55, 7  ;;  %v385_v58 = vld [vmem:[%s384_s20] sm:$0xf] }
 0x17a   : > { %2240 = vmatpush2.bf16.msra.mxu0 %v3724_v59  ;;  %v649_v57 = vsub.s32 0, %v648_v56  ;;  %v653_v59 = vsub.s32 1, %v648_v56 }
 0x17b   : > { %2281 = vmatpush2.bf16.msra.mxu1 %v3727_v60  ;;  %2241 = vmatprep.subr.bf16.mxu0 %v3732_v61 }
 0x17c   : > { %2282 = vmatprep.subr.bf16.mxu1 %v3735_v62  ;;  %v650_v60 = vrot.slane %v385_v58, %v649_v57  ;;  %v654_v61 = vrot.slane %v385_v58, %v653_v59 }
 0x17e   : > { %2242 = vmatpush2.bf16.msra.mxu0 %v3730_v63 }
 0x17f   : > { %2283 = vmatpush2.bf16.msra.mxu1 %v3733_v0  ;;  %2243 = vmatprep.subr.bf16.mxu0 %v3738_v1  ;;  %v3792_v0 = vld [vmem:[%s4253_s16 + $0xd0] sm:$0xff]  }
 0x180   : > { %2284 = vmatprep.subr.bf16.mxu1 %v3741_v2  ;;  %v3793_v2 = vld [vmem:[%s4253_s16 + $0x90] sm:$0xff]  }
 0x182   : > { %2244 = vmatpush2.bf16.msra.mxu0 %v3736_v3 }
 0x183   : > { %2285 = vmatpush2.bf16.msra.mxu1 %v3739_v4  ;;  %2245 = vmatprep.subr.bf16.mxu0 %v3744_v5 }
 0x184   : > { %2286 = vmatprep.subr.bf16.mxu1 %v3747_v6 }
 0x186   : > { %2246 = vmatpush2.bf16.msra.mxu0 %v3742_v9 }
 0x187   : > { %2287 = vmatpush2.bf16.msra.mxu1 %v3745_v10  ;;  %2247 = vmatprep.subr.bf16.mxu0 %v3750_v11  ;;  %v3794_v11 = vld [vmem:[%s4253_s16 + $0xc8] sm:$0xff]  }
 0x188   : > { %2288 = vmatprep.subr.bf16.mxu1 %v3753_v12 }
 0x18a   : > { %2248 = vmatpush2.bf16.msra.mxu0 %v3748_v13 }
 0x18b   : > { %2289 = vmatpush2.bf16.msra.mxu1 %v3751_v14  ;;  %2249 = vmatprep.subr.bf16.mxu0 %v3756_v15  ;;  %v3795_v14 = vld [vmem:[%s4253_s16 + $0x88] sm:$0xff]  }
 0x18c   : > { %2290 = vmatprep.subr.bf16.mxu1 %v3759_v16 }
 0x18e   : > { %2250 = vmatpush2.bf16.msra.mxu0 %v3754_v19 }
 0x18f   : > { %2291 = vmatpush2.bf16.msra.mxu1 %v3757_v20  ;;  %2251 = vmatprep.subr.bf16.mxu0 %v3762_v21 }
 0x190   : > { %2292 = vmatprep.subr.bf16.mxu1 %v3765_v22 }
 0x192   : > { %2252 = vmatpush2.bf16.msra.mxu0 %v3760_v23  ;;  %v3796_v23 = vld [vmem:[%s4253_s16 + $0xc0] sm:$0xff]  }
 0x193   : > { %2293 = vmatpush2.bf16.msra.mxu1 %v3763_v24  ;;  %3208 = vmatprep.subr.bf16.mxu0 %v3766_v25  ;;  %v3797_v25 = vld [vmem:[%s4253_s16 + $0x80] sm:$0xff]  }
 0x194   : > { %3230 = vmatprep.subr.bf16.mxu1 %v3782_v37 }
 0x195   : > { %v4582_v28 = vpop.f32.mrf.mxu0  ;;  %2254 = vmatmul.mubr.bf16.vlgmr.msra.gmra.mxu0 %v4439_v17  ;;  %v3771_v17 = vld [vmem:[%s4253_s16 + $0x28] sm:$0xff]  }
 0x196   : > { %v4584_v29 = vpop.f32.mrf.mxu1  ;;  %2295 = vmatmul.mubr.bf16.vlgmr.msra.gmra.mxu1 %v4443_v18  ;;  %3209 = vmatpush3.bf16.msra.mxu0 %v3767_v26  ;;  %v2010_v62 = vadd.f32 %v4582_v28, %v650_v60 }
 0x197   : > { %v4589_v31 = vpop.f32.mrf.mxu0  ;;  %3210 = vmatprep.subr.bf16.mxu0 %v3768_v27  ;;  %3231 = vmatpush3.bf16.msra.mxu1 %v3783_v38 }
 0x198   : > { %v4591_v32 = vpop.f32.mrf.mxu1  ;;  %3232 = vmatprep.subr.bf16.mxu1 %v3784_v34  ;;  %v2012_v63 = vadd.f32 %v4589_v31, %v654_v61  ;;  %v2051_v1 = vadd.f32 %v4584_v29, %v2010_v62 }
 0x199   : > { %v2013_v8 = vpop.f32.mrf.mxu0 }
 0x19a   : > { %v2054_v48 = vpop.f32.mrf.mxu1  ;;  %3211 = vmatpush3.bf16.msra.mxu0 %v3769_v30  ;;  %v2053_v5 = vadd.f32 %v4591_v32, %v2012_v63 }
 0x19b   : > { %v2014_v18 = vpop.f32.mrf.mxu0  ;;  %3212 = vmatprep.subr.bf16.mxu0 %v3770_v7  ;;  %3233 = vmatpush3.bf16.msra.mxu1 %v3785_v36 }
 0x19c   : > { %v2055_v33 = vpop.f32.mrf.mxu1  ;;  %3234 = vmatprep.subr.bf16.mxu1 %v3786_v40 }
 0x19e   : > { %3213 = vmatpush3.bf16.msra.mxu0 %v3771_v17  ;;  %v657_v17 = vsub.s32 2, %v648_v56 }
 0x19f   : > { %3214 = vmatprep.subr.bf16.mxu0 %v3772_v52  ;;  %3235 = vmatpush3.bf16.msra.mxu1 %v3787_v42  ;;  %v661_v52 = vsub.s32 3, %v648_v56 }
 0x1a0   : > { %3236 = vmatprep.subr.bf16.mxu1 %v3788_v44  ;;  %v658_v18 = vrot.slane %v385_v58, %v657_v17 }
 0x1a1   : > { %v662_v33 = vrot.slane %v385_v58, %v661_v52 }
 0x1a2   : > { %3215 = vmatpush3.bf16.msra.mxu0 %v3773_v35 }
 0x1a3   : > { %3216 = vmatprep.subr.bf16.mxu0 %v3774_v39  ;;  %3237 = vmatpush3.bf16.msra.mxu1 %v3789_v46 }
 0x1a4   : > { %3238 = vmatprep.subr.bf16.mxu1 %v3790_v49 }
 0x1a6   : > { %3217 = vmatpush3.bf16.msra.mxu0 %v3775_v41 }
 0x1a7   : > { %3218 = vmatprep.subr.bf16.mxu0 %v3776_v43  ;;  %3239 = vmatpush3.bf16.msra.mxu1 %v3791_v51 }
 0x1a8   : > { %3240 = vmatprep.subr.bf16.mxu1 %v3792_v0  ;;  %v2303_v0 = vld [vmem:[#allocation2] sm:$0xff] }
 0x1aa   : > { %3219 = vmatpush3.bf16.msra.mxu0 %v3777_v45 }
 0x1ab   : > { %3220 = vmatprep.subr.bf16.mxu0 %v3778_v47  ;;  %3241 = vmatpush3.bf16.msra.mxu1 %v3793_v2 }
 0x1ac   : > { %3242 = vmatprep.subr.bf16.mxu1 %v3794_v11 }
 0x1ae   : > { %3221 = vmatpush3.bf16.msra.mxu0 %v3779_v50 }
 0x1af   : > { %3222 = vmatprep.subr.bf16.mxu0 %v3780_v53  ;;  %3243 = vmatpush3.bf16.msra.mxu1 %v3795_v14 }
 0x1b0   : > { %3244 = vmatprep.subr.bf16.mxu1 %v3796_v23 }
 0x1b2   : > { %3223 = vmatpush3.bf16.msra.mxu0 %v3781_v54 }
 0x1b3   : > { %3245 = vmatpush3.bf16.msra.mxu1 %v3797_v25 }
 0x1d5   : > { %v2091_v3 = vpop.f32.mrf.mxu0 }
 0x1d6   : > { %v2132_v4 = vpop.f32.mrf.mxu1  ;;  %v2092_v6 = vadd.f32 %v2091_v3, %v2051_v1 }
 0x1d7   : > { %v2093_v9 = vpop.f32.mrf.mxu0 }
 0x1d8   : > { %v2134_v10 = vpop.f32.mrf.mxu1  ;;  %v2133_v12 = vadd.f32 %v2132_v4, %v2092_v6  ;;  %v2094_v13 = vadd.f32 %v2093_v9, %v2053_v5 }
 0x1d9   : > { %v2095_v15 = vpop.f32.mrf.mxu0 }
 0x1da   : > { %v2136_v16 = vpop.f32.mrf.mxu1  ;;  %v2135_v19 = vadd.f32 %v2134_v10, %v2094_v13  ;;  %v2304_v20 = vmax.f32 %v2133_v12, 0.0 }
 0x1db   : > { %v2096_v21 = vpop.f32.mrf.mxu0 }
 0x1dc   : > { %v2137_v22 = vpop.f32.mrf.mxu1  ;;  %v2305_v24 = vmax.f32 %v2135_v19, 0.0  ;;  %v2308_v27 = vpack.c.bf16 %v2304_v20, %v2304_v20 }
 0x1de   : > { %v2309_v26 = vpack.c.bf16 %v2305_v24, %v2305_v24 }
 0x1e0   : > { %2600 = vmatprep.mubr.bf16.mxu0 %v2309_v26 }
 0x1e1   : > { %2601 = vmatmul.mubr.bf16.vlgmr.msra.gmra.mxu0 %v2308_v27 }
 0x215   : > { %v2173_v28 = vpop.f32.mrf.mxu0 }
 0x216   : > { %v2214_v29 = vpop.f32.mrf.mxu1  ;;  %v2174_v37 = vadd.f32 %v2173_v28, %v658_v18 }
 0x217   : > { %v2175_v30 = vpop.f32.mrf.mxu0 }
 0x218   : > { %v2216_v31 = vpop.f32.mrf.mxu1  ;;  %v2176_v38 = vadd.f32 %v2175_v30, %v662_v33  ;;  %v2215_v34 = vadd.f32 %v2214_v29, %v2174_v37 }
 0x219   : > { %v2177_v32 = vpop.f32.mrf.mxu0 }
 0x21a   : > { %v2218_v7 = vpop.f32.mrf.mxu1  ;;  %v2217_v39 = vadd.f32 %v2216_v31, %v2176_v38 }
 0x21b   : > { %v2178_v8 = vpop.f32.mrf.mxu0 }
 0x21c   : > { %v2219_v48 = vpop.f32.mrf.mxu1 }
 0x255   : > { %v2255_v35 = vpop.f32.mrf.mxu0 }
 0x256   : > { %v2296_v36 = vpop.f32.mrf.mxu1  ;;  %v2256_v40 = vadd.f32 %v2255_v35, %v2215_v34 }
 0x257   : > { %v2257_v41 = vpop.f32.mrf.mxu0 }
 0x258   : > { %v2298_v42 = vpop.f32.mrf.mxu1  ;;  %v2297_v43 = vadd.f32 %v2296_v36, %v2256_v40  ;;  %v2258_v44 = vadd.f32 %v2257_v41, %v2217_v39 }
 0x259   : > { %v2259_v45 = vpop.f32.mrf.mxu0 }
 0x25a   : > { %v2300_v46 = vpop.f32.mrf.mxu1  ;;  %v2299_v47 = vadd.f32 %v2298_v42, %v2258_v44  ;;  %v2306_v49 = vmax.f32 %v2297_v43, 0.0 }
 0x25b   : > { %v2260_v50 = vpop.f32.mrf.mxu0 }
 0x25c   : > { %v2301_v51 = vpop.f32.mrf.mxu1  ;;  %v2307_v53 = vmax.f32 %v2299_v47, 0.0  ;;  %v2310_v55 = vpack.c.bf16 %v2306_v49, %v2306_v49 }
 0x25e   : > { %v2311_v54 = vpack.c.bf16 %v2307_v53, %v2307_v53 }
 0x260   : > { %2640 = vmatprep.mubr.bf16.mxu1 %v2311_v54 }
 0x261   : > { %2641 = vmatmul.mubr.bf16.vlgmr.msra.gmra.mxu1 %v2310_v55 }
 0x2a1   : > { %v3224_v56 = vpop.f32.mrf.mxu0 }
 0x2a3   : > { %v3225_v57 = vpop.f32.mrf.mxu0 }
 0x2a4   : > { %v3226_v58 = vadd.f32 %v3225_v57, %v3224_v56 }
 0x2a5   : > { %v3227_v59 = vpop.f32.mrf.mxu0 }
 0x2a7   : > { %v3228_v60 = vpop.f32.mrf.mxu0 }
 0x321   : > { %v3246_v61 = vpop.f32.mrf.mxu1 }
 0x323   : > { %v3247_v62 = vpop.f32.mrf.mxu1 }
 0x324   : > { %v3248_v63 = vadd.f32 %v3247_v62, %v3246_v61 }
 0x325   : > { %v3249_v1 = vpop.f32.mrf.mxu1 }
 0x326   : > { %v2643_v2 = vadd.f32 %v3248_v63, %v3226_v58  ;;  %2653 = sbr.rel (%p3193_p11) target bundleno = 1043 (0x413), region = 80 }
 0x327   : > { %v3250_v3 = vpop.f32.mrf.mxu1 }
 0x328   : > { %v2648_v4 = vadd.f32 %v2643_v2, %v2303_v0 }
 0x32a   : > { %2649 = vst [vmem:[#allocation2] sm:$0xff] %v2648_v4 }
 0x32b   : > { %v3798_v5 = vld [vmem:[#allocation9 + $0x38] sm:$0xff]   ;;  %v4030_v6 = vmov 0.0   ;;  %v3799_v9 = vld [vmem:[#allocation9 + $0x30] sm:$0xff]   ;;  %vm4031_vm0 = vmmov 0   ;;  %v3800_v10 = vld [vmem:[#allocation9 + $0x28] sm:$0xff]  }
 0x32c   : > { %3261 = vmatprep.subr.bf16.mxu0 %v4030_v6  ;;  %3277 = vmatprep.mubr.msk.bf16.mxu0 %vm4031_vm0, %v4030_v6  ;;  %v3801_v11 = vld [vmem:[#allocation9 + $0x20] sm:$0xff]   ;;  %v3802_v12 = vld [vmem:[#allocation9 + $0x18] sm:$0xff]   ;;  %v3803_v13 = vld [vmem:[#allocation9 + $0x10] sm:$0xff]  }
 0x32d   : > { %3262 = vmatpush3.bf16.msra.mxu0 %v3798_v5  ;;  %v3194_v15 = vld [vmem:[#allocation8] ss:$0 sm:$0xff]  ;;  %v3804_v19 = vld [vmem:[#allocation9 + $0x8] sm:$0xff]   ;;  %v3805_v21 = vld [vmem:[#allocation9] sm:$0xff]  }
 0x32e   : > { %3263 = vmatprep.subr.bf16.mxu0 %v4030_v6  ;;  %v3195_v23 = vld [vmem:[#allocation11] ss:$0 sm:$0xff] }
 0x331   : > { %3264 = vmatpush3.bf16.msra.mxu0 %v3799_v9  ;;  %v2654_v14 = vld [vmem:[#allocation2] sm:$0xff] }
 0x332   : > { %3265 = vmatprep.subr.bf16.mxu0 %v4030_v6  ;;  %v2662_v16 = vadd.f32 %v3194_v15, %v2654_v14 }
 0x334   : > { %v2663_v20 = vmax.f32 %v2662_v16, 0.0 }
 0x335   : > { %3266 = vmatpush3.bf16.msra.mxu0 %v3800_v10 }
 0x336   : > { %3267 = vmatprep.subr.bf16.mxu0 %v4030_v6  ;;  %v2664_v22 = vpack.c.bf16 %v2663_v20, %v2663_v20 }
 0x339   : > { %3268 = vmatpush3.bf16.msra.mxu0 %v3801_v11 }
 0x33a   : > { %3269 = vmatprep.subr.bf16.mxu0 %v4030_v6 }
 0x33d   : > { %3270 = vmatpush3.bf16.msra.mxu0 %v3802_v12 }
 0x33e   : > { %3271 = vmatprep.subr.bf16.mxu0 %v4030_v6 }
 0x341   : > { %3272 = vmatpush3.bf16.msra.mxu0 %v3803_v13 }
 0x342   : > { %3273 = vmatprep.subr.bf16.mxu0 %v4030_v6 }
 0x345   : > { %3274 = vmatpush3.bf16.msra.mxu0 %v3804_v19 }
 0x346   : > { %3275 = vmatprep.subr.bf16.mxu0 %v4030_v6 }
 0x349   : > { %3276 = vmatpush3.bf16.msra.mxu0 %v3805_v21 }
 0x34c   : > { %3278 = vmatmul.mubr.bf16.vlgmr.msra.gmra.mxu0 %v2664_v22 }
 0x40c   : > { %v2770_v24 = vpop.f32.mrf.mxu0 }
 0x40d   : > { %v2771_v25 = vadd.f32 %v3195_v23, %v2770_v24 }
 0x40e   : > { %v3279_v26 = vpop.f32.mrf.mxu0 }
 0x40f   : > { %2776 = vst [vmem:[%s4650_s7] sm:$0xff] %v2771_v25 }
 0x410   : > { %v2773_v27 = vpop.f32.mrf.mxu0 }
 0x412   : > { %v3280_v28 = vpop.f32.mrf.mxu0 }
 0x413 PF: > { %p19_p4 = scmp.ge.s32.totalorder %s4138_s21, 4   ;;  %s4679_s24 = smov %s4008_s25 }
 0x414   : > { %s4680_s25 = smov %s4012_s26  ;;  %s4681_s26 = smov %s4149_s8 }
 0x415   : > { %s4682_s27 = smov %s4138_s21  ;;  %21 = sbr.rel (!%p19_p4) target bundleno = 5 (0x5), region = 120 }
 0x41a   :  { %2788 = vsyncpa [#allocation4], 1 }
 0x41b   :  { %2790 = vsyncpa [#allocation4 + $0x1], 1 }
 0x41c   :  { %2791 = vsyncpa [#allocation6], 1 }
 0x41d   :  { %2792 = vsyncpa [#allocation10], 1 }

</bundles_post_ra>
